<compile_context>
chip_gen: v7x
topology: tpu7x:2x2x1
jax: 0.10.0
libtpu: 0.0.40
codegen_flags: <defaults>
</compile_context>

<pallas_src>
import functools

import jax
import jax.numpy as jnp
import numpy as np
from jax.experimental import pallas as pl
from jax.experimental.pallas import tpu as pltpu


def _retina_loss_kernel(cls_ref, reg_ref, anch_ref, annt_ref, anntT_ref,
                        out_ref, acc_ref, *, image_w, image_h, alpha, gamma,
                        beta, epsilon):
    f32 = jnp.float32
    t = pl.program_id(2)
    npt = pl.num_programs(2)

    # ---- per-(image, split) accumulator init ----
    @pl.when(t == 0)
    def _():
        acc_ref[...] = jnp.zeros_like(acc_ref)

    cls_am = cls_ref[0].astype(f32)       # (TA, C)  anchor-major (as the model emits)
    reg = reg_ref[0].astype(f32)          # (4, TA)
    anch = anch_ref[0].astype(f32)        # (4, TA)
    annt = annt_ref[0].astype(f32)        # (M, 5)
    annt_t = anntT_ref[0].astype(f32)     # (5, M)

    TA, C = cls_am.shape
    M = annt.shape[0]

    # ---- in-kernel transpose of the dominant cls tensor: exact MXU identity
    #      matmul (NT form, same dimension-numbers as q @ k^T in flash attn) ----
    ri = jax.lax.broadcasted_iota(jnp.int32, (C, C), 0)
    ci = jax.lax.broadcasted_iota(jnp.int32, (C, C), 1)
    eye_c = (ri == ci).astype(f32)
    cls = jax.lax.dot_general(eye_c, cls_am, (((1,), (1,)), ((), ())),
                              precision=jax.lax.Precision.HIGHEST,
                              preferred_element_type=f32)          # (C, TA)

    a_tl = anch[0:2, :]                                            # (2, TA)
    a_br = anch[2:4, :]
    ax0 = anch[0:1, :]; ay0 = anch[1:2, :]
    ax1 = anch[2:3, :]; ay1 = anch[3:4, :]
    gx0 = annt[:, 0:1]; gy0 = annt[:, 1:2]                         # (M, 1)
    gx1 = annt[:, 2:3]; gy1 = annt[:, 3:4]
    gcl = annt[:, 4:5]

    # ---- drop_out_border_anchors_and_heads (as a mask) ----
    border_ok = (ax0 > 0.0) & (ay0 > 0.0) & (ax1 < image_w) & (ay1 < image_h)

    # ---- pairwise IoU (M, TA): anchors lane-dense, gt boxes on sublanes ----
    ov_w = jnp.maximum(jnp.minimum(ax1, gx1) - jnp.maximum(ax0, gx0), 0.0)
    ov_h = jnp.maximum(jnp.minimum(ay1, gy1) - jnp.maximum(ay0, gy0), 0.0)
    ov_area = ov_w * ov_h                                          # (M, TA)
    a_wh1 = a_br - a_tl + 1.0                                      # (2, TA)
    a_area = a_wh1[0:1, :] * a_wh1[1:2, :]                         # (1, TA)
    g_area = (gx1 - gx0 + 1.0) * (gy1 - gy0 + 1.0)                 # (M, 1)
    union = jnp.maximum(a_area + g_area - ov_area, 0.0001)
    # approx reciprocal: IoU only feeds 0.4/0.5 thresholds + an argmax over
    # these same values, so the EUP approx is safe.
    ious = ov_area * pl.reciprocal(union, approx=True)             # (M, TA)

    ann_valid = gcl >= 0.0                                         # (M, 1)
    masked = jnp.where(ann_valid, ious, -1.0)
    overlap = jnp.max(masked, axis=0, keepdims=True)               # (1, TA)

    # first-argmax over the (small) M axis
    row_f = jax.lax.broadcasted_iota(jnp.int32, (M, TA), 0).astype(f32)
    cand = jnp.where(masked == overlap, row_f, float(M))
    idx = jnp.min(cand, axis=0, keepdims=True)                     # (1, TA)
    one_hot = (row_f == idx).astype(f32)                           # (M, TA)

    # ---- gather assigned annotation: one small exact MXU matmul (5,M)@(M,TA) ----
    gathered = jax.lax.dot_general(annt_t, one_hot, (((1,), (0,)), ((), ())),
                                   precision=jax.lax.Precision.HIGHEST,
                                   preferred_element_type=f32)     # (5, TA)
    b_tl = gathered[0:2, :]
    b_br = gathered[2:4, :]
    bcl = gathered[4:5, :]

    # ---- snap_annotations_as_tx_ty_tw_th, stacked (2, TA) ----
    a_wh = a_br - a_tl
    a_ctr = a_tl + 0.5 * a_wh
    inv_awh = 1.0 / a_wh                                           # one divide, reused
    g_wh = jnp.maximum(b_br - b_tl, 1.0)
    g_ctr = b_tl + 0.5 * g_wh
    t_xy = (g_ctr - a_ctr) * inv_awh * 10.0                        # /0.1 folded
    t_wh = jnp.log(g_wh * inv_awh) * 5.0                           # /0.2 folded

    # ---- anchor class assignment ----
    gt_class = jnp.full((1, TA), -1.0, dtype=f32)
    gt_class = jnp.where(overlap < 0.4, 0.0, gt_class)
    gt_class = jnp.where(overlap >= 0.5, bcl + 1.0, gt_class)
    has_ann = jnp.max(gcl, axis=0, keepdims=True) >= 0.0           # (1, 1)
    gt_class = jnp.where(has_ann, gt_class, -1.0)
    gt_class = jnp.where(border_ok, gt_class, -1.0)
    pos = gt_class > 0.0                                           # (1, TA)
    valid = gt_class >= 0.0                                        # (1, TA)

    # ---- focal (cls) loss, lane-dense (C, TA) ----
    p = jnp.clip(cls, epsilon, 1.0 - epsilon)
    cls_iota = jax.lax.broadcasted_iota(jnp.int32, (C, 1), 0).astype(f32) + 1.0
    gt_oh = gt_class == cls_iota                                   # (C, TA) via broadcast
    alpha_pos = jnp.where(valid, alpha, 0.0)                       # valid mask folded in
    alpha_neg = jnp.where(valid, 1.0 - alpha, 0.0)
    alpha_f = jnp.where(gt_oh, alpha_pos, alpha_neg)               # (C, TA)
    pt = jnp.where(gt_oh, p, 1.0 - p)
    om = 1.0 - pt
    if float(gamma) == int(gamma) and int(gamma) >= 1:             # integer power, no exp/log
        pw = om
        for _ in range(int(gamma) - 1):
            pw = pw * om
    else:
        pw = om ** gamma
    # TODO(synk): optional bf16 log on v6e/v7x EUP (skipped: ~0.3-0.5% rel error).
    focal = alpha_f * pw * (-jnp.log(pt))                          # bce = -log(pt)
    focal_row = jnp.sum(focal, axis=0, keepdims=True)              # (1, TA)

    # ---- smooth-L1 (reg) loss, stacked (2, TA) ----
    half_beta = 0.5 * beta
    inv_2beta = 0.5 / beta

    def sl1(x):
        return jnp.where(x >= beta, x - half_beta, x * x * inv_2beta)

    x_xy = jnp.abs(reg[0:2, :] - t_xy)
    x_wh = jnp.abs(reg[2:4, :] - t_wh)
    sl_row = 0.25 * (jnp.sum(sl1(x_xy), axis=0, keepdims=True)
                     + jnp.sum(sl1(x_wh), axis=0, keepdims=True))  # (1, TA)
    sl_row = jnp.where(pos, sl_row, 0.0)

    # ---- accumulate per-tile partials in VMEM (no per-tile scalar reduce) ----
    acc_ref[0:1, :] += focal_row
    acc_ref[1:2, :] += sl_row
    acc_ref[2:3, :] += pos.astype(f32)

    # ---- finalize at the last anchor tile: single cross-lane reduce + one
    #      lane-dense (1, 128) store of the three raw sums ----
    @pl.when(t == npt - 1)
    def _():
        f_sum = jnp.sum(acc_ref[0:1, :], axis=1, keepdims=True)    # (1, 1)
        s_sum = jnp.sum(acc_ref[1:2, :], axis=1, keepdims=True)
        n_sum = jnp.sum(acc_ref[2:3, :], axis=1, keepdims=True)
        lane = jax.lax.broadcasted_iota(jnp.int32, (1, 128), 1)
        out_ref[0, 0] = (jnp.where(lane == 0, f_sum, 0.0)
                         + jnp.where(lane == 1, s_sum, 0.0)
                         + jnp.where(lane == 2, n_sum, 0.0))


def retina_loss(cls_heads, reg_heads, batch_anchors, annotations, *,
                image_w, image_h, alpha=0.25, gamma=2, beta=1.0 / 9.0,
                epsilon=0.0001, anchor_tile=8192, anchor_splits=2,
                vmem_limit_bytes=48 * 1024 * 1024):
    # TODO(synk): a channel-major model head would also remove the single
    # concatenate pass below; with this (PyTorch-shaped) interface one concat
    # per tensor is unavoidable, but pad is fused into it and cls is never
    # transposed or copied again in HBM.
    B = int(cls_heads[0].shape[0])
    C = int(cls_heads[0].shape[-1])
    A = sum(int(h.shape[1]) for h in cls_heads)
    M = int(annotations.shape[1])

    # Anchor tiling: lane-aligned tile, split axis for v7x's 2 TensorCores.
    anchor_tile = max(128, (int(anchor_tile) // 128) * 128)
    a_128 = ((A + 127) // 128) * 128
    TA = min(anchor_tile, a_128)
    S = max(1, int(anchor_splits))
    blk = S * TA
    A_pad = ((A + blk - 1) // blk) * blk
    pad_n = A_pad - A
    npt = A_pad // blk

    cls_list = list(cls_heads)
    reg_list = list(reg_heads)
    anch_list = list(batch_anchors)
    if pad_n:
        # Padded anchors: non-degenerate box fully outside the border -> always dropped.
        pad_box = jnp.array([-10.0, -10.0, -6.0, -6.0], dtype=batch_anchors[0].dtype)
        cls_list.append(jnp.full((B, pad_n, C), 0.5, dtype=cls_heads[0].dtype))
        reg_list.append(jnp.zeros((B, pad_n, 4), dtype=reg_heads[0].dtype))
        anch_list.append(jnp.broadcast_to(pad_box[None, None, :], (B, pad_n, 4)))

    # Single concat pass each; cls stays anchor-major (and may be bf16).
    cls = jnp.concatenate(cls_list, axis=1)                              # (B, A_pad, C)
    reg = jnp.transpose(jnp.concatenate(reg_list, axis=1), (0, 2, 1))    # (B, 4, A_pad)
    anch = jnp.transpose(jnp.concatenate(anch_list, axis=1), (0, 2, 1))  # (B, 4, A_pad)

    # Pad annotations to M % 8 == 0 (extra rows are class -1 => masked out).
    M_pad = ((M + 7) // 8) * 8
    annt = annotations.astype(jnp.float32)
    if M_pad != M:
        annt = jnp.concatenate(
            [annt, jnp.full((B, M_pad - M, 5), -1.0, dtype=jnp.float32)], axis=1)
    annt_t = jnp.transpose(annt, (0, 2, 1))                              # (B, 5, M_pad)

    kernel = functools.partial(
        _retina_loss_kernel,
        image_w=float(image_w), image_h=float(image_h),
        alpha=float(alpha), gamma=gamma, beta=float(beta), epsilon=float(epsilon))

    grid_spec = pltpu.PrefetchScalarGridSpec(
        num_scalar_prefetch=0,
        grid=(B, S, npt),
        in_specs=[
            pl.BlockSpec((1, TA, C), lambda b, s, t: (b, s * npt + t, 0)),
            pl.BlockSpec((1, 4, TA), lambda b, s, t: (b, 0, s * npt + t)),
            pl.BlockSpec((1, 4, TA), lambda b, s, t: (b, 0, s * npt + t)),
            pl.BlockSpec((1, M_pad, 5), lambda b, s, t: (b, 0, 0)),
            pl.BlockSpec((1, 5, M_pad), lambda b, s, t: (b, 0, 0)),
        ],
        out_specs=pl.BlockSpec((1, 1, 1, 128), lambda b, s, t: (b, s, 0, 0)),
        scratch_shapes=[pltpu.VMEM((3, TA), jnp.float32)],
    )

    out = pl.pallas_call(
        kernel,
        out_shape=jax.ShapeDtypeStruct((B, S, 1, 128), jnp.float32),
        grid_spec=grid_spec,
        compiler_params=pltpu.CompilerParams(
            dimension_semantics=("parallel", "parallel", "arbitrary"),
            vmem_limit_bytes=int(vmem_limit_bytes)),
    )(cls, reg, anch, annt, annt_t)

    raw = out[:, :, 0, :]                              # (B, S, 128)
    focal_img = jnp.sum(raw[:, :, 0], axis=1)          # (B,)
    sl_img = jnp.sum(raw[:, :, 1], axis=1)
    npos = jnp.sum(raw[:, :, 2], axis=1)

    has_pos = npos > 0.0
    safe = jnp.maximum(npos, 1.0)
    cls_per = jnp.where(has_pos, focal_img / safe, 0.0)
    reg_per = jnp.where(has_pos, sl_img / safe, 0.0)
    # Matches torch semantics: divide by number of images with >=1 positive
    # anchor (NaN if that count is 0, exactly like the reference).
    valid_num = jnp.sum(has_pos.astype(jnp.float32))
    cls_loss = jnp.sum(cls_per) / valid_num
    reg_loss = jnp.sum(reg_per) / valid_num
    return cls_loss, reg_loss


# ------------------- pure numpy reference (follows the torch code) -------------------
def _ref_retina_loss(cls_heads, reg_heads, batch_anchors, annotations, image_w, image_h,
                     alpha=0.25, gamma=2, beta=1.0 / 9.0, epsilon=0.0001):
    cls = np.concatenate([np.asarray(x) for x in cls_heads], axis=1)
    reg = np.concatenate([np.asarray(x) for x in reg_heads], axis=1)
    anch = np.concatenate([np.asarray(x) for x in batch_anchors], axis=1)
    ann = np.asarray(annotations)
    B = cls.shape[0]
    cls_losses, reg_losses, valid_image_num = [], [], 0
    for b in range(B):
        a, c, r = anch[b], cls[b], reg[b]
        keep = (a[:, 0] > 0) & (a[:, 1] > 0) & (a[:, 2] < image_w) & (a[:, 3] < image_h)
        a, c, r = a[keep], c[keep], r[keep]
        one_ann = ann[b]
        one_ann = one_ann[one_ann[:, 4] >= 0]
        A = a.shape[0]
        if one_ann.shape[0] == 0:
            aa = np.ones((A, 5), np.float32) * -1
        else:
            gt, gcls = one_ann[:, :4], one_ann[:, 4]
            ious = []
            for m in range(gt.shape[0]):
                g = gt[m]
                ow = np.maximum(np.minimum(a[:, 2], g[2]) - np.maximum(a[:, 0], g[0]), 0)
                oh = np.maximum(np.minimum(a[:, 3], g[3]) - np.maximum(a[:, 1], g[1]), 0)
                oarea = ow * oh
                aarea = (a[:, 2] - a[:, 0] + 1) * (a[:, 3] - a[:, 1] + 1)
                garea = (g[2] - g[0] + 1) * (g[3] - g[1] + 1)
                union = np.maximum(aarea + garea - oarea, 1e-4)
                ious.append(oarea / union)
            ious = np.stack(ious, axis=1)
            overlap, indices = ious.max(axis=1), ious.argmax(axis=1)
            agt = gt[indices]
            aw, ah = a[:, 2] - a[:, 0], a[:, 3] - a[:, 1]
            acx, acy = a[:, 0] + 0.5 * aw, a[:, 1] + 0.5 * ah
            gw = np.maximum(agt[:, 2] - agt[:, 0], 1.0)
            gh = np.maximum(agt[:, 3] - agt[:, 1], 1.0)
            gcx, gcy = agt[:, 0] + 0.5 * gw, agt[:, 1] + 0.5 * gh
            snapped = np.stack([(gcx - acx) / aw / 0.1, (gcy - acy) / ah / 0.1,
                                np.log(gw / aw) / 0.2, np.log(gh / ah) / 0.2], axis=1)
            klass = np.ones(A, np.float32) * -1
            klass[overlap < 0.4] = 0
            pos = overlap >= 0.5
            klass[pos] = gcls[indices][pos] + 1
            aa = np.concatenate([snapped, klass[:, None]], axis=1).astype(np.float32)
        npos = int((aa[:, 4] > 0).sum())
        if npos == 0:
            cls_losses.append(0.0); reg_losses.append(0.0); continue
        valid_image_num += 1
        keep_c = aa[:, 4] >= 0
        pc = np.clip(c[keep_c], epsilon, 1 - epsilon)
        lab = aa[keep_c, 4].astype(int)
        Cn = pc.shape[1]
        oh = np.zeros((pc.shape[0], Cn + 1), np.float32)
        oh[np.arange(pc.shape[0]), lab] = 1
        oh = oh[:, 1:]
        af = np.where(oh == 1, alpha, 1 - alpha)
        pt = np.where(oh == 1, pc, 1 - pc)
        fw = af * (1 - pt) ** gamma
        bce = -(oh * np.log(pc) + (1 - oh) * np.log(1 - pc))
        cls_losses.append(float((fw * bce).sum() / npos))
        keep_r = aa[:, 4] > 0
        x = np.abs(r[keep_r] - aa[keep_r, :4])
        sl1 = np.where(x >= beta, x - 0.5 * beta, 0.5 * x * x / beta)
        reg_losses.append(float(sl1.mean(axis=1).sum() / npos))
    return sum(cls_losses) / valid_image_num, sum(reg_losses) / valid_image_num


if __name__ == "__main__":
    key = jax.random.PRNGKey(0)
    B, C = 2, 8
    image_w = image_h = 64.0

    def make_level(stride, size):
        n = int(64 // stride)
        cs = (jnp.arange(n, dtype=jnp.float32) + 0.5) * stride
        cx, cy = jnp.meshgrid(cs, cs, indexing="xy")
        cx, cy = cx.reshape(-1), cy.reshape(-1)
        half = size / 2.0
        return jnp.stack([cx - half, cy - half, cx + half, cy + half], axis=1)

    lvl1 = make_level(16, 20.0)   # (16, 4)
    lvl2 = make_level(32, 40.0)   # (4, 4)  (all out of border -> dropped)
    batch_anchors = [jnp.broadcast_to(l[None], (B,) + l.shape) for l in (lvl1, lvl2)]

    k1, k2, k3, k4 = jax.random.split(key, 4)
    # cls heads fed in bf16 (kernel casts to f32 internally); reference sees the
    # same bf16-rounded values in f32.
    cls_heads = [jax.nn.sigmoid(jax.random.normal(k1, (B, 16, C), dtype=jnp.float32)).astype(jnp.bfloat16),
                 jax.nn.sigmoid(jax.random.normal(k2, (B, 4, C), dtype=jnp.float32)).astype(jnp.bfloat16)]
    reg_heads = [0.1 * jax.random.normal(k3, (B, 16, 4), dtype=jnp.float32),
                 0.1 * jax.random.normal(k4, (B, 4, 4), dtype=jnp.float32)]

    annotations = jnp.array([
        [[14., 14., 34., 34., 2.],
         [30., 10., 50., 30., 0.],
         [-1., -1., -1., -1., -1.],
         [-1., -1., -1., -1., -1.]],
        [[13., 13., 35., 35., 1.],
         [-1., -1., -1., -1., -1.],
         [-1., -1., -1., -1., -1.],
         [-1., -1., -1., -1., -1.]],
    ], dtype=jnp.float32)

    cls_loss, reg_loss = retina_loss(cls_heads, reg_heads, batch_anchors, annotations,
                                     image_w=image_w, image_h=image_h)
    cls_loss = jax.block_until_ready(cls_loss)
    reg_loss = jax.block_until_ready(reg_loss)

    cls_heads_f32 = [h.astype(jnp.float32) for h in cls_heads]
    ref_cls, ref_reg = _ref_retina_loss(cls_heads_f32, reg_heads, batch_anchors, annotations,
                                        image_w, image_h)
    assert np.allclose(float(cls_loss), ref_cls, rtol=1e-3, atol=1e-4), (float(cls_loss), ref_cls)
    assert np.allclose(float(reg_loss), ref_reg, rtol=1e-3, atol=1e-4), (float(reg_loss), ref_reg)

    print("KERNEL_OK")
</pallas_src>

<mosaic_0001>
module attributes {stable_mosaic.version = 11 : i64} {
  func.func @_retina_loss_kernel(%arg0: i32, %arg1: i32, %arg2: i32, %arg3: memref<1x128x8xbf16, #tpu.memory_space<vmem>>, %arg4: memref<1x4x128xf32, #tpu.memory_space<vmem>>, %arg5: memref<1x4x128xf32, #tpu.memory_space<vmem>>, %arg6: memref<1x8x5xf32, #tpu.memory_space<vmem>>, %arg7: memref<1x5x8xf32, #tpu.memory_space<vmem>>, %arg8: memref<1x1x1x128xf32, #tpu.memory_space<vmem>>, %arg9: memref<3x128xf32, #tpu.memory_space<vmem>>) attributes {dimension_semantics = [#tpu.dimension_semantics<parallel>, #tpu.dimension_semantics<parallel>, #tpu.dimension_semantics<arbitrary>], iteration_bounds = array<i64: 2, 2, 1>, scalar_prefetch = 0 : i64, scratch_operands = 1 : i64, tpu.core_type = #tpu.core_type<tc>, window_params = [{transform_indices = @transform_0, window_bounds = array<i64: 1, 128, 8>}, {transform_indices = @transform_1, window_bounds = array<i64: 1, 4, 128>}, {transform_indices = @transform_2, window_bounds = array<i64: 1, 4, 128>}, {transform_indices = @transform_3, window_bounds = array<i64: 1, 8, 5>}, {transform_indices = @transform_4, window_bounds = array<i64: 1, 5, 8>}, {transform_indices = @transform_5, window_bounds = array<i64: 1, 1, 1, 128>}]} {
    %c0_i32 = arith.constant 0 : i32
    %0 = arith.cmpi eq, %arg2, %c0_i32 : i32
    %1 = arith.extui %0 : i1 to i32
    %c0_i32_0 = arith.constant 0 : i32
    %2 = arith.cmpi ne, %1, %c0_i32_0 : i32
    scf.if %2 {
      %cst_81 = arith.constant 0.000000e+00 : f32
      %230 = vector.broadcast %cst_81 : f32 to vector<3x128xf32>
      %c0_82 = arith.constant 0 : index
      %c0_83 = arith.constant 0 : index
      %231 = vector.load %arg9[%c0_82, %c0_83] : memref<3x128xf32, #tpu.memory_space<vmem>>, vector<3x128xf32>
      tpu.vector_store %arg9[%c0_82, %c0_83], %230 {strides = array<i32>} : memref<3x128xf32, #tpu.memory_space<vmem>>, vector<3x128xf32>,
    } else {
    }
    %c0 = arith.constant 0 : index
    %c0_1 = arith.constant 0 : index
    %c0_2 = arith.constant 0 : index
    %3 = vector.load %arg3[%c0, %c0_1, %c0_2] : memref<1x128x8xbf16, #tpu.memory_space<vmem>>, vector<1x128x8xbf16>
    %4 = vector.shape_cast %3 : vector<1x128x8xbf16> to vector<128x8xbf16>
    %5 = arith.extf %4 : vector<128x8xbf16> to vector<128x8xf32>
    %c0_3 = arith.constant 0 : index
    %c0_4 = arith.constant 0 : index
    %c0_5 = arith.constant 0 : index
    %6 = vector.load %arg4[%c0_3, %c0_4, %c0_5] : memref<1x4x128xf32, #tpu.memory_space<vmem>>, vector<1x4x128xf32>
    %7 = vector.shape_cast %6 : vector<1x4x128xf32> to vector<4x128xf32>
    %c0_6 = arith.constant 0 : index
    %c0_7 = arith.constant 0 : index
    %c0_8 = arith.constant 0 : index
    %8 = vector.load %arg5[%c0_6, %c0_7, %c0_8] : memref<1x4x128xf32, #tpu.memory_space<vmem>>, vector<1x4x128xf32>
    %9 = vector.shape_cast %8 : vector<1x4x128xf32> to vector<4x128xf32>
    %c0_9 = arith.constant 0 : index
    %c0_10 = arith.constant 0 : index
    %c0_11 = arith.constant 0 : index
    %10 = vector.load %arg6[%c0_9, %c0_10, %c0_11] : memref<1x8x5xf32, #tpu.memory_space<vmem>>, vector<1x8x5xf32>
    %11 = vector.shape_cast %10 : vector<1x8x5xf32> to vector<8x5xf32>
    %c0_12 = arith.constant 0 : index
    %c0_13 = arith.constant 0 : index
    %c0_14 = arith.constant 0 : index
    %12 = vector.load %arg7[%c0_12, %c0_13, %c0_14] : memref<1x5x8xf32, #tpu.memory_space<vmem>>, vector<1x5x8xf32>
    %13 = vector.shape_cast %12 : vector<1x5x8xf32> to vector<5x8xf32>
    %14 = tpu.iota {dimensions = array<i32: 0>} : vector<8x8xi32>
    %15 = tpu.iota {dimensions = array<i32: 1>} : vector<8x8xi32>
    %16 = arith.cmpi eq, %14, %15 : vector<8x8xi32>
    %17 = arith.extui %16 : vector<8x8xi1> to vector<8x8xi32>
    %18 = arith.sitofp %17 : vector<8x8xi32> to vector<8x8xf32>
    %cst = arith.constant dense<0.000000e+00> : vector<8x128xf32>
    %19 = tpu.matmul %18, %5, %cst {dimension_numbers = #tpu.dot_dimension_numbers<[1], [1], [0], [0], [0, 0, 1, 0], [], []>, precision = #tpu.contract_precision<fp32>} : vector<8x8xf32>, vector<128x8xf32>, vector<8x128xf32> -> vector<8x128xf32>
    %20 = vector.extract_strided_slice %9 {offsets = [0, 0], sizes = [2, 128], strides = [1, 1]} : vector<4x128xf32> to vector<2x128xf32>
    %21 = vector.extract_strided_slice %9 {offsets = [2, 0], sizes = [2, 128], strides = [1, 1]} : vector<4x128xf32> to vector<2x128xf32>
    %22 = vector.extract_strided_slice %9 {offsets = [0, 0], sizes = [1, 128], strides = [1, 1]} : vector<4x128xf32> to vector<1x128xf32>
    %23 = vector.extract_strided_slice %9 {offsets = [1, 0], sizes = [1, 128], strides = [1, 1]} : vector<4x128xf32> to vector<1x128xf32>
    %24 = vector.extract_strided_slice %9 {offsets = [2, 0], sizes = [1, 128], strides = [1, 1]} : vector<4x128xf32> to vector<1x128xf32>
    %25 = vector.extract_strided_slice %9 {offsets = [3, 0], sizes = [1, 128], strides = [1, 1]} : vector<4x128xf32> to vector<1x128xf32>
    %26 = vector.extract_strided_slice %11 {offsets = [0, 0], sizes = [8, 1], strides = [1, 1]} : vector<8x5xf32> to vector<8x1xf32>
    %27 = vector.extract_strided_slice %11 {offsets = [0, 1], sizes = [8, 1], strides = [1, 1]} : vector<8x5xf32> to vector<8x1xf32>
    %28 = vector.extract_strided_slice %11 {offsets = [0, 2], sizes = [8, 1], strides = [1, 1]} : vector<8x5xf32> to vector<8x1xf32>
    %29 = vector.extract_strided_slice %11 {offsets = [0, 3], sizes = [8, 1], strides = [1, 1]} : vector<8x5xf32> to vector<8x1xf32>
    %30 = vector.extract_strided_slice %11 {offsets = [0, 4], sizes = [8, 1], strides = [1, 1]} : vector<8x5xf32> to vector<8x1xf32>
    %cst_15 = arith.constant 0.000000e+00 : f32
    %31 = vector.broadcast %cst_15 : f32 to vector<1x128xf32>
    %32 = arith.cmpf ogt, %22, %31 : vector<1x128xf32>
    %cst_16 = arith.constant 0.000000e+00 : f32
    %33 = vector.broadcast %cst_16 : f32 to vector<1x128xf32>
    %34 = arith.cmpf ogt, %23, %33 : vector<1x128xf32>
    %35 = arith.andi %32, %34 : vector<1x128xi1>
    %cst_17 = arith.constant 6.400000e+01 : f32
    %36 = vector.broadcast %cst_17 : f32 to vector<1x128xf32>
    %37 = arith.cmpf olt, %24, %36 : vector<1x128xf32>
    %38 = arith.andi %35, %37 : vector<1x128xi1>
    %cst_18 = arith.constant 6.400000e+01 : f32
    %39 = vector.broadcast %cst_18 : f32 to vector<1x128xf32>
    %40 = arith.cmpf olt, %25, %39 : vector<1x128xf32>
    %41 = arith.andi %38, %40 : vector<1x128xi1>
    %42 = vector.broadcast %24 : vector<1x128xf32> to vector<8x128xf32>
    %43 = vector.broadcast %28 : vector<8x1xf32> to vector<8x128xf32>
    %44 = arith.minimumf %42, %43 : vector<8x128xf32>
    %45 = vector.broadcast %22 : vector<1x128xf32> to vector<8x128xf32>
    %46 = vector.broadcast %26 : vector<8x1xf32> to vector<8x128xf32>
    %47 = arith.maximumf %45, %46 : vector<8x128xf32>
    %48 = arith.subf %44, %47 : vector<8x128xf32>
    %cst_19 = arith.constant 0.000000e+00 : f32
    %49 = vector.broadcast %cst_19 : f32 to vector<8x128xf32>
    %50 = arith.maximumf %48, %49 : vector<8x128xf32>
    %51 = vector.broadcast %25 : vector<1x128xf32> to vector<8x128xf32>
    %52 = vector.broadcast %29 : vector<8x1xf32> to vector<8x128xf32>
    %53 = arith.minimumf %51, %52 : vector<8x128xf32>
    %54 = vector.broadcast %23 : vector<1x128xf32> to vector<8x128xf32>
    %55 = vector.broadcast %27 : vector<8x1xf32> to vector<8x128xf32>
    %56 = arith.maximumf %54, %55 : vector<8x128xf32>
    %57 = arith.subf %53, %56 : vector<8x128xf32>
    %cst_20 = arith.constant 0.000000e+00 : f32
    %58 = vector.broadcast %cst_20 : f32 to vector<8x128xf32>
    %59 = arith.maximumf %57, %58 : vector<8x128xf32>
    %60 = arith.mulf %50, %59 : vector<8x128xf32>
    %61 = arith.subf %21, %20 : vector<2x128xf32>
    %cst_21 = arith.constant 1.000000e+00 : f32
    %62 = vector.broadcast %cst_21 : f32 to vector<2x128xf32>
    %63 = arith.addf %61, %62 : vector<2x128xf32>
    %64 = vector.extract_strided_slice %63 {offsets = [0, 0], sizes = [1, 128], strides = [1, 1]} : vector<2x128xf32> to vector<1x128xf32>
    %65 = vector.extract_strided_slice %63 {offsets = [1, 0], sizes = [1, 128], strides = [1, 1]} : vector<2x128xf32> to vector<1x128xf32>
    %66 = arith.mulf %64, %65 : vector<1x128xf32>
    %67 = arith.subf %28, %26 : vector<8x1xf32>
    %cst_22 = arith.constant 1.000000e+00 : f32
    %68 = vector.broadcast %cst_22 : f32 to vector<8x1xf32>
    %69 = arith.addf %67, %68 : vector<8x1xf32>
    %70 = arith.subf %29, %27 : vector<8x1xf32>
    %cst_23 = arith.constant 1.000000e+00 : f32
    %71 = vector.broadcast %cst_23 : f32 to vector<8x1xf32>
    %72 = arith.addf %70, %71 : vector<8x1xf32>
    %73 = arith.mulf %69, %72 : vector<8x1xf32>
    %74 = vector.broadcast %66 : vector<1x128xf32> to vector<8x128xf32>
    %75 = vector.broadcast %73 : vector<8x1xf32> to vector<8x128xf32>
    %76 = arith.addf %74, %75 : vector<8x128xf32>
    %77 = arith.subf %76, %60 : vector<8x128xf32>
    %cst_24 = arith.constant 9.99999974E-5 : f32
    %78 = vector.broadcast %cst_24 : f32 to vector<8x128xf32>
    %79 = arith.maximumf %77, %78 : vector<8x128xf32>
    %80 = tpu.reciprocal %79 {approx = true} : vector<8x128xf32> -> vector<8x128xf32>
    %81 = arith.mulf %60, %80 : vector<8x128xf32>
    %cst_25 = arith.constant 0.000000e+00 : f32
    %82 = vector.broadcast %cst_25 : f32 to vector<8x1xf32>
    %83 = arith.cmpf oge, %30, %82 : vector<8x1xf32>
    %cst_26 = arith.constant -1.000000e+00 : f32
    %84 = vector.shape_cast %83 : vector<8x1xi1> to vector<8x1xi1>
    %85 = vector.broadcast %84 : vector<8x1xi1> to vector<8x128xi1>
    %86 = vector.broadcast %cst_26 : f32 to vector<8x128xf32>
    %87 = arith.select %85, %81, %86 : vector<8x128xi1>, vector<8x128xf32>
    %cst_27 = arith.constant dense<0xFF800000> : vector<128xf32>
    %88 = vector.multi_reduction <maximumf>, %87, %cst_27 [0] : vector<8x128xf32> to vector<128xf32>
    %89 = vector.shape_cast %88 : vector<128xf32> to vector<1x128xf32>
    %90 = tpu.iota {dimensions = array<i32: 0>} : vector<8x128xi32>
    %91 = arith.sitofp %90 : vector<8x128xi32> to vector<8x128xf32>
    %92 = vector.broadcast %89 : vector<1x128xf32> to vector<8x128xf32>
    %93 = arith.cmpf oeq, %87, %92 : vector<8x128xf32>
    %cst_28 = arith.constant 8.000000e+00 : f32
    %94 = vector.broadcast %cst_28 : f32 to vector<8x128xf32>
    %95 = arith.select %93, %91, %94 : vector<8x128xi1>, vector<8x128xf32>
    %cst_29 = arith.constant dense<0x7F800000> : vector<128xf32>
    %96 = vector.multi_reduction <minimumf>, %95, %cst_29 [0] : vector<8x128xf32> to vector<128xf32>
    %97 = vector.shape_cast %96 : vector<128xf32> to vector<1x128xf32>
    %98 = vector.broadcast %97 : vector<1x128xf32> to vector<8x128xf32>
    %99 = arith.cmpf oeq, %91, %98 : vector<8x128xf32>
    %100 = arith.extui %99 : vector<8x128xi1> to vector<8x128xi32>
    %101 = arith.sitofp %100 : vector<8x128xi32> to vector<8x128xf32>
    %cst_30 = arith.constant dense<0.000000e+00> : vector<5x128xf32>
    %102 = tpu.matmul %13, %101, %cst_30 {dimension_numbers = #tpu.dot_dimension_numbers<[1], [0], [0], [1], [0, 0, 1, 1], [], []>, precision = #tpu.contract_precision<fp32>} : vector<5x8xf32>, vector<8x128xf32>, vector<5x128xf32> -> vector<5x128xf32>
    %103 = vector.extract_strided_slice %102 {offsets = [0, 0], sizes = [2, 128], strides = [1, 1]} : vector<5x128xf32> to vector<2x128xf32>
    %104 = vector.extract_strided_slice %102 {offsets = [2, 0], sizes = [2, 128], strides = [1, 1]} : vector<5x128xf32> to vector<2x128xf32>
    %105 = vector.extract_strided_slice %102 {offsets = [4, 0], sizes = [1, 128], strides = [1, 1]} : vector<5x128xf32> to vector<1x128xf32>
    %106 = arith.subf %21, %20 : vector<2x128xf32>
    %cst_31 = arith.constant 5.000000e-01 : f32
    %107 = vector.broadcast %cst_31 : f32 to vector<2x128xf32>
    %108 = arith.mulf %107, %106 : vector<2x128xf32>
    %109 = arith.addf %20, %108 : vector<2x128xf32>
    %cst_32 = arith.constant 1.000000e+00 : f32
    %110 = vector.broadcast %cst_32 : f32 to vector<2x128xf32>
    %111 = arith.divf %110, %106 : vector<2x128xf32>
    %112 = arith.subf %104, %103 : vector<2x128xf32>
    %cst_33 = arith.constant 1.000000e+00 : f32
    %113 = vector.broadcast %cst_33 : f32 to vector<2x128xf32>
    %114 = arith.maximumf %112, %113 : vector<2x128xf32>
    %cst_34 = arith.constant 5.000000e-01 : f32
    %115 = vector.broadcast %cst_34 : f32 to vector<2x128xf32>
    %116 = arith.mulf %115, %114 : vector<2x128xf32>
    %117 = arith.addf %103, %116 : vector<2x128xf32>
    %118 = arith.subf %117, %109 : vector<2x128xf32>
    %119 = arith.mulf %118, %111 : vector<2x128xf32>
    %cst_35 = arith.constant 1.000000e+01 : f32
    %120 = vector.broadcast %cst_35 : f32 to vector<2x128xf32>
    %121 = arith.mulf %119, %120 : vector<2x128xf32>
    %122 = arith.mulf %114, %111 : vector<2x128xf32>
    %123 = math.log %122 : vector<2x128xf32>
    %cst_36 = arith.constant 5.000000e+00 : f32
    %124 = vector.broadcast %cst_36 : f32 to vector<2x128xf32>
    %125 = arith.mulf %123, %124 : vector<2x128xf32>
    %cst_37 = arith.constant -1.000000e+00 : f32
    %126 = vector.broadcast %cst_37 : f32 to vector<1x128xf32>
    %cst_38 = arith.constant 4.000000e-01 : f32
    %127 = vector.broadcast %cst_38 : f32 to vector<1x128xf32>
    %128 = arith.cmpf olt, %89, %127 : vector<1x128xf32>
    %cst_39 = arith.constant 0.000000e+00 : f32
    %129 = vector.broadcast %cst_39 : f32 to vector<1x128xf32>
    %130 = arith.select %128, %129, %126 : vector<1x128xi1>, vector<1x128xf32>
    %cst_40 = arith.constant 5.000000e-01 : f32
    %131 = vector.broadcast %cst_40 : f32 to vector<1x128xf32>
    %132 = arith.cmpf oge, %89, %131 : vector<1x128xf32>
    %cst_41 = arith.constant 1.000000e+00 : f32
    %133 = vector.broadcast %cst_41 : f32 to vector<1x128xf32>
    %134 = arith.addf %105, %133 : vector<1x128xf32>
    %135 = arith.select %132, %134, %130 : vector<1x128xi1>, vector<1x128xf32>
    %cst_42 = arith.constant dense<0xFF800000> : vector<1xf32>
    %136 = vector.multi_reduction <maximumf>, %30, %cst_42 [0] : vector<8x1xf32> to vector<1xf32>
    %137 = vector.shape_cast %136 : vector<1xf32> to vector<1x1xf32>
    %cst_43 = arith.constant 0.000000e+00 : f32
    %138 = vector.broadcast %cst_43 : f32 to vector<1x1xf32>
    %139 = arith.cmpf oge, %137, %138 : vector<1x1xf32>
    %cst_44 = arith.constant -1.000000e+00 : f32
    %140 = vector.shape_cast %139 : vector<1x1xi1> to vector<1x1xi1>
    %141 = vector.broadcast %140 : vector<1x1xi1> to vector<1x128xi1>
    %142 = vector.broadcast %cst_44 : f32 to vector<1x128xf32>
    %143 = arith.select %141, %135, %142 : vector<1x128xi1>, vector<1x128xf32>
    %cst_45 = arith.constant -1.000000e+00 : f32
    %144 = vector.broadcast %cst_45 : f32 to vector<1x128xf32>
    %145 = arith.select %41, %143, %144 : vector<1x128xi1>, vector<1x128xf32>
    %cst_46 = arith.constant 0.000000e+00 : f32
    %146 = vector.broadcast %cst_46 : f32 to vector<1x128xf32>
    %147 = arith.cmpf ogt, %145, %146 : vector<1x128xf32>
    %cst_47 = arith.constant 0.000000e+00 : f32
    %148 = vector.broadcast %cst_47 : f32 to vector<1x128xf32>
    %149 = arith.cmpf oge, %145, %148 : vector<1x128xf32>
    %cst_48 = arith.constant 9.99999974E-5 : f32
    %cst_49 = arith.constant 0.999899983 : f32
    %150 = vector.broadcast %cst_48 : f32 to vector<8x128xf32>
    %151 = arith.maximumf %150, %19 : vector<8x128xf32>
    %152 = vector.broadcast %cst_49 : f32 to vector<8x128xf32>
    %153 = arith.minimumf %152, %151 : vector<8x128xf32>
    %154 = tpu.iota {dimensions = array<i32: 0>} : vector<8x1xi32>
    %155 = arith.sitofp %154 : vector<8x1xi32> to vector<8x1xf32>
    %cst_50 = arith.constant 1.000000e+00 : f32
    %156 = vector.broadcast %cst_50 : f32 to vector<8x1xf32>
    %157 = arith.addf %155, %156 : vector<8x1xf32>
    %158 = vector.broadcast %145 : vector<1x128xf32> to vector<8x128xf32>
    %159 = vector.broadcast %157 : vector<8x1xf32> to vector<8x128xf32>
    %160 = arith.cmpf oeq, %158, %159 : vector<8x128xf32>
    %cst_51 = arith.constant 2.500000e-01 : f32
    %cst_52 = arith.constant 0.000000e+00 : f32
    %161 = vector.broadcast %cst_51 : f32 to vector<1x128xf32>
    %162 = vector.broadcast %cst_52 : f32 to vector<1x128xf32>
    %163 = arith.select %149, %161, %162 : vector<1x128xi1>, vector<1x128xf32>
    %cst_53 = arith.constant 7.500000e-01 : f32
    %cst_54 = arith.constant 0.000000e+00 : f32
    %164 = vector.broadcast %cst_53 : f32 to vector<1x128xf32>
    %165 = vector.broadcast %cst_54 : f32 to vector<1x128xf32>
    %166 = arith.select %149, %164, %165 : vector<1x128xi1>, vector<1x128xf32>
    %167 = vector.shape_cast %163 : vector<1x128xf32> to vector<1x128xf32>
    %168 = vector.broadcast %167 : vector<1x128xf32> to vector<8x128xf32>
    %169 = vector.shape_cast %166 : vector<1x128xf32> to vector<1x128xf32>
    %170 = vector.broadcast %169 : vector<1x128xf32> to vector<8x128xf32>
    %171 = arith.select %160, %168, %170 : vector<8x128xi1>, vector<8x128xf32>
    %cst_55 = arith.constant 1.000000e+00 : f32
    %172 = vector.broadcast %cst_55 : f32 to vector<8x128xf32>
    %173 = arith.subf %172, %153 : vector<8x128xf32>
    %174 = arith.select %160, %153, %173 : vector<8x128xi1>, vector<8x128xf32>
    %cst_56 = arith.constant 1.000000e+00 : f32
    %175 = vector.broadcast %cst_56 : f32 to vector<8x128xf32>
    %176 = arith.subf %175, %174 : vector<8x128xf32>
    %177 = arith.mulf %176, %176 : vector<8x128xf32>
    %178 = arith.mulf %171, %177 : vector<8x128xf32>
    %179 = math.log %174 : vector<8x128xf32>
    %cst_57 = arith.constant 0.000000e+00 : f32
    %180 = vector.broadcast %cst_57 : f32 to vector<8x128xf32>
    %181 = arith.subf %180, %179 : vector<8x128xf32>
    %182 = arith.mulf %178, %181 : vector<8x128xf32>
    %cst_58 = arith.constant dense<0.000000e+00> : vector<128xf32>
    %183 = vector.multi_reduction <add>, %182, %cst_58 [0] : vector<8x128xf32> to vector<128xf32>
    %184 = vector.shape_cast %183 : vector<128xf32> to vector<1x128xf32>
    %185 = vector.extract_strided_slice %7 {offsets = [0, 0], sizes = [2, 128], strides = [1, 1]} : vector<4x128xf32> to vector<2x128xf32>
    %186 = arith.subf %185, %121 : vector<2x128xf32>
    %187 = math.absf %186 : vector<2x128xf32>
    %188 = vector.extract_strided_slice %7 {offsets = [2, 0], sizes = [2, 128], strides = [1, 1]} : vector<4x128xf32> to vector<2x128xf32>
    %189 = arith.subf %188, %125 : vector<2x128xf32>
    %190 = math.absf %189 : vector<2x128xf32>
    %cst_59 = arith.constant 0.111111112 : f32
    %191 = vector.broadcast %cst_59 : f32 to vector<2x128xf32>
    %192 = arith.cmpf oge, %187, %191 : vector<2x128xf32>
    %cst_60 = arith.constant 0.055555556 : f32
    %193 = vector.broadcast %cst_60 : f32 to vector<2x128xf32>
    %194 = arith.subf %187, %193 : vector<2x128xf32>
    %195 = arith.mulf %187, %187 : vector<2x128xf32>
    %cst_61 = arith.constant 4.500000e+00 : f32
    %196 = vector.broadcast %cst_61 : f32 to vector<2x128xf32>
    %197 = arith.mulf %195, %196 : vector<2x128xf32>
    %198 = arith.select %192, %194, %197 : vector<2x128xi1>, vector<2x128xf32>
    %cst_62 = arith.constant dense<0.000000e+00> : vector<128xf32>
    %199 = vector.multi_reduction <add>, %198, %cst_62 [0] : vector<2x128xf32> to vector<128xf32>
    %200 = vector.shape_cast %199 : vector<128xf32> to vector<1x128xf32>
    %cst_63 = arith.constant 0.111111112 : f32
    %201 = vector.broadcast %cst_63 : f32 to vector<2x128xf32>
    %202 = arith.cmpf oge, %190, %201 : vector<2x128xf32>
    %cst_64 = arith.constant 0.055555556 : f32
    %203 = vector.broadcast %cst_64 : f32 to vector<2x128xf32>
    %204 = arith.subf %190, %203 : vector<2x128xf32>
    %205 = arith.mulf %190, %190 : vector<2x128xf32>
    %cst_65 = arith.constant 4.500000e+00 : f32
    %206 = vector.broadcast %cst_65 : f32 to vector<2x128xf32>
    %207 = arith.mulf %205, %206 : vector<2x128xf32>
    %208 = arith.select %202, %204, %207 : vector<2x128xi1>, vector<2x128xf32>
    %cst_66 = arith.constant dense<0.000000e+00> : vector<128xf32>
    %209 = vector.multi_reduction <add>, %208, %cst_66 [0] : vector<2x128xf32> to vector<128xf32>
    %210 = vector.shape_cast %209 : vector<128xf32> to vector<1x128xf32>
    %211 = arith.addf %200, %210 : vector<1x128xf32>
    %cst_67 = arith.constant 2.500000e-01 : f32
    %212 = vector.broadcast %cst_67 : f32 to vector<1x128xf32>
    %213 = arith.mulf %212, %211 : vector<1x128xf32>
    %cst_68 = arith.constant 0.000000e+00 : f32
    %214 = vector.broadcast %cst_68 : f32 to vector<1x128xf32>
    %215 = arith.select %147, %213, %214 : vector<1x128xi1>, vector<1x128xf32>
    %c0_69 = arith.constant 0 : index
    %c0_70 = arith.constant 0 : index
    %216 = vector.load %arg9[%c0_69, %c0_70] : memref<3x128xf32, #tpu.memory_space<vmem>>, vector<1x128xf32>
    %217 = arith.addf %216, %184 : vector<1x128xf32>
    %c0_71 = arith.constant 0 : index
    %c0_72 = arith.constant 0 : index
    %218 = vector.load %arg9[%c0_71, %c0_72] : memref<3x128xf32, #tpu.memory_space<vmem>>, vector<1x128xf32>
    tpu.vector_store %arg9[%c0_71, %c0_72], %217 {strides = array<i32>} : memref<3x128xf32, #tpu.memory_space<vmem>>, vector<1x128xf32>,
    %c1 = arith.constant 1 : index
    %c0_73 = arith.constant 0 : index
    %219 = vector.load %arg9[%c1, %c0_73] : memref<3x128xf32, #tpu.memory_space<vmem>>, vector<1x128xf32>
    %220 = arith.addf %219, %215 : vector<1x128xf32>
    %c1_74 = arith.constant 1 : index
    %c0_75 = arith.constant 0 : index
    %221 = vector.load %arg9[%c1_74, %c0_75] : memref<3x128xf32, #tpu.memory_space<vmem>>, vector<1x128xf32>
    tpu.vector_store %arg9[%c1_74, %c0_75], %220 {strides = array<i32>} : memref<3x128xf32, #tpu.memory_space<vmem>>, vector<1x128xf32>,
    %c2 = arith.constant 2 : index
    %c0_76 = arith.constant 0 : index
    %222 = vector.load %arg9[%c2, %c0_76] : memref<3x128xf32, #tpu.memory_space<vmem>>, vector<1x128xf32>
    %223 = arith.extui %147 : vector<1x128xi1> to vector<1x128xi32>
    %224 = arith.sitofp %223 : vector<1x128xi32> to vector<1x128xf32>
    %225 = arith.addf %222, %224 : vector<1x128xf32>
    %c2_77 = arith.constant 2 : index
    %c0_78 = arith.constant 0 : index
    %226 = vector.load %arg9[%c2_77, %c0_78] : memref<3x128xf32, #tpu.memory_space<vmem>>, vector<1x128xf32>
    tpu.vector_store %arg9[%c2_77, %c0_78], %225 {strides = array<i32>} : memref<3x128xf32, #tpu.memory_space<vmem>>, vector<1x128xf32>,
    %c0_i32_79 = arith.constant 0 : i32
    %227 = arith.cmpi eq, %arg2, %c0_i32_79 : i32
    %228 = arith.extui %227 : i1 to i32
    %c0_i32_80 = arith.constant 0 : i32
    %229 = arith.cmpi ne, %228, %c0_i32_80 : i32
    scf.if %229 {
      %c0_81 = arith.constant 0 : index
      %c0_82 = arith.constant 0 : index
      %230 = vector.load %arg9[%c0_81, %c0_82] : memref<3x128xf32, #tpu.memory_space<vmem>>, vector<1x128xf32>
      %cst_83 = arith.constant dense<0.000000e+00> : vector<1xf32>
      %231 = vector.multi_reduction <add>, %230, %cst_83 [1] : vector<1x128xf32> to vector<1xf32>
      %232 = vector.shape_cast %231 : vector<1xf32> to vector<1x1xf32>
      %c1_84 = arith.constant 1 : index
      %c0_85 = arith.constant 0 : index
      %233 = vector.load %arg9[%c1_84, %c0_85] : memref<3x128xf32, #tpu.memory_space<vmem>>, vector<1x128xf32>
      %cst_86 = arith.constant dense<0.000000e+00> : vector<1xf32>
      %234 = vector.multi_reduction <add>, %233, %cst_86 [1] : vector<1x128xf32> to vector<1xf32>
      %235 = vector.shape_cast %234 : vector<1xf32> to vector<1x1xf32>
      %c2_87 = arith.constant 2 : index
      %c0_88 = arith.constant 0 : index
      %236 = vector.load %arg9[%c2_87, %c0_88] : memref<3x128xf32, #tpu.memory_space<vmem>>, vector<1x128xf32>
      %cst_89 = arith.constant dense<0.000000e+00> : vector<1xf32>
      %237 = vector.multi_reduction <add>, %236, %cst_89 [1] : vector<1x128xf32> to vector<1xf32>
      %238 = vector.shape_cast %237 : vector<1xf32> to vector<1x1xf32>
      %239 = tpu.iota {dimensions = array<i32: 1>} : vector<1x128xi32>
      %c0_i32_90 = arith.constant 0 : i32
      %240 = vector.broadcast %c0_i32_90 : i32 to vector<1x128xi32>
      %241 = arith.cmpi eq, %239, %240 : vector<1x128xi32>
      %cst_91 = arith.constant 0.000000e+00 : f32
      %242 = vector.shape_cast %232 : vector<1x1xf32> to vector<1x1xf32>
      %243 = vector.broadcast %242 : vector<1x1xf32> to vector<1x128xf32>
      %244 = vector.broadcast %cst_91 : f32 to vector<1x128xf32>
      %245 = arith.select %241, %243, %244 : vector<1x128xi1>, vector<1x128xf32>
      %c1_i32 = arith.constant 1 : i32
      %246 = vector.broadcast %c1_i32 : i32 to vector<1x128xi32>
      %247 = arith.cmpi eq, %239, %246 : vector<1x128xi32>
      %cst_92 = arith.constant 0.000000e+00 : f32
      %248 = vector.shape_cast %235 : vector<1x1xf32> to vector<1x1xf32>
      %249 = vector.broadcast %248 : vector<1x1xf32> to vector<1x128xf32>
      %250 = vector.broadcast %cst_92 : f32 to vector<1x128xf32>
      %251 = arith.select %247, %249, %250 : vector<1x128xi1>, vector<1x128xf32>
      %252 = arith.addf %245, %251 : vector<1x128xf32>
      %c2_i32 = arith.constant 2 : i32
      %253 = vector.broadcast %c2_i32 : i32 to vector<1x128xi32>
      %254 = arith.cmpi eq, %239, %253 : vector<1x128xi32>
      %cst_93 = arith.constant 0.000000e+00 : f32
      %255 = vector.shape_cast %238 : vector<1x1xf32> to vector<1x1xf32>
      %256 = vector.broadcast %255 : vector<1x1xf32> to vector<1x128xf32>
      %257 = vector.broadcast %cst_93 : f32 to vector<1x128xf32>
      %258 = arith.select %254, %256, %257 : vector<1x128xi1>, vector<1x128xf32>
      %259 = arith.addf %252, %258 : vector<1x128xf32>
      %c0_94 = arith.constant 0 : index
      %c0_95 = arith.constant 0 : index
      %c0_96 = arith.constant 0 : index
      %c0_97 = arith.constant 0 : index
      %260 = vector.load %arg8[%c0_94, %c0_95, %c0_96, %c0_97] : memref<1x1x1x128xf32, #tpu.memory_space<vmem>>, vector<1x1x1x128xf32>
      %261 = vector.shape_cast %260 : vector<1x1x1x128xf32> to vector<1x128xf32>
      %262 = vector.shape_cast %259 : vector<1x128xf32> to vector<1x1x1x128xf32>
      tpu.vector_store %arg8[%c0_94, %c0_95, %c0_96, %c0_97], %262 {strides = array<i32>} : memref<1x1x1x128xf32, #tpu.memory_space<vmem>>, vector<1x1x1x128xf32>,
    } else {
    }
    return
  }
  func.func @transform_0(%arg0: i32, %arg1: i32, %arg2: i32) -> (i32, i32, i32) {
    %c1_i32 = arith.constant 1 : i32
    %0 = arith.muli %arg1, %c1_i32 : i32
    %1 = arith.addi %0, %arg2 : i32
    %c0_i32 = arith.constant 0 : i32
    %c0_i32_0 = arith.constant 0 : i32
    return %arg0, %1, %c0_i32 : i32, i32, i32
  }
  func.func @transform_1(%arg0: i32, %arg1: i32, %arg2: i32) -> (i32, i32, i32) {
    %c1_i32 = arith.constant 1 : i32
    %0 = arith.muli %arg1, %c1_i32 : i32
    %1 = arith.addi %0, %arg2 : i32
    %c0_i32 = arith.constant 0 : i32
    %c0_i32_0 = arith.constant 0 : i32
    return %arg0, %c0_i32, %1 : i32, i32, i32
  }
  func.func @transform_2(%arg0: i32, %arg1: i32, %arg2: i32) -> (i32, i32, i32) {
    %c1_i32 = arith.constant 1 : i32
    %0 = arith.muli %arg1, %c1_i32 : i32
    %1 = arith.addi %0, %arg2 : i32
    %c0_i32 = arith.constant 0 : i32
    %c0_i32_0 = arith.constant 0 : i32
    return %arg0, %c0_i32, %1 : i32, i32, i32
  }
  func.func @transform_3(%arg0: i32, %arg1: i32, %arg2: i32) -> (i32, i32, i32) {
    %c0_i32 = arith.constant 0 : i32
    %c0_i32_0 = arith.constant 0 : i32
    %c0_i32_1 = arith.constant 0 : i32
    return %arg0, %c0_i32, %c0_i32_0 : i32, i32, i32
  }
  func.func @transform_4(%arg0: i32, %arg1: i32, %arg2: i32) -> (i32, i32, i32) {
    %c0_i32 = arith.constant 0 : i32
    %c0_i32_0 = arith.constant 0 : i32
    %c0_i32_1 = arith.constant 0 : i32
    return %arg0, %c0_i32, %c0_i32_0 : i32, i32, i32
  }
  func.func @transform_5(%arg0: i32, %arg1: i32, %arg2: i32) -> (i32, i32, i32, i32) {
    %c0_i32 = arith.constant 0 : i32
    %c0_i32_0 = arith.constant 0 : i32
    %c0_i32_1 = arith.constant 0 : i32
    return %arg0, %arg1, %c0_i32, %c0_i32_0 : i32, i32, i32, i32
  }
}

</mosaic_0001>

<bundles_post_ra>
// kernel: tpu_custom_call.1
= control target key start
LH: loop header
LB: loop body
LE: loop exit
PB: predicated region body
PF: predicated region fallthrough
CT: control target
= control target key end

     0   :  { %10 = vsyncpa [#allocation4], 0  ;;  %s3466_s0 = inlined_call_operand.vmem [shape: bf16[2,256,8], index: 0, kind: input, shape index: {}]   ;;  %s3467_s1 = inlined_call_operand.vmem [shape: f32[2,4,256], index: 1, kind: input, shape index: {}]   ;;  %s3468_s2 = inlined_call_operand.vmem [shape: f32[2,4,256], index: 2, kind: input, shape index: {}]   ;;  %s3469_s3 = inlined_call_operand.vmem [shape: f32[2,8,5], index: 3, kind: input, shape index: {}]   ;;  %s3470_s4 = inlined_call_operand.vmem [shape: f32[2,5,8], index: 4, kind: input, shape index: {}]   ;;  %s3471_s5 = inlined_call_operand.hbm [shape: f32[2,2,1,128], index: 5, kind: output, shape index: {}]  }
   0x1   :  { %12 = vsyncpa [#allocation4 + $0x1], 0  ;;  %s2882_s18 = smov 0   ;;  %s2884_s19 = smov 0  }
   0x2   :  { %s2886_s20 = smov 0   ;;  %s2888_s21 = smov 0  }
   0x3   :  { %s2890_s22 = smov 0   ;;  %s2892_s23 = smov 0  }
   0x4   :  { %s2894_s24 = smov 0   ;;  %s2896_s25 = smov 0  }
   0x5 LB: > { %s1989_s26 = sadd.s32 4294967295, %s2837_s25   ;;  %s1990_s27 = sadd.s32 4294967294, %s2837_s25   ;;  %s2837_s25 = sphi %s2896_s25, %s18_s25   ;;  %s2833_s24 = sphi %s2894_s24, %s3486_s24   ;;  %s2829_s23 = sphi %s2892_s23, %s3485_s23   ;;  %s2825_s22 = sphi %s2890_s22, %s3484_s22   ;;  %s2821_s21 = sphi %s2888_s21, %s3483_s21   ;;  %s2817_s20 = sphi %s2886_s20, %s3482_s20   ;;  %s2813_s19 = sphi %s2884_s19, %s3481_s19   ;;  %s2809_s18 = sphi %s2882_s18, %s3480_s18  }
   0x6   : > { %s33_s28 = sadd.s32 1, %s2829_s23  ;;  %s37_s29 = sadd.s32 1, %s2833_s24 }
   0x7   : > { %p35_p0 = scmp.ge.s32.totalorder %s33_s28, 2  ;;  %p198_p1 = scmp.ne.s32.totalorder %s2817_s20, %s2813_s19 }
   0x8   : > { %p199_p2 = scmp.eq.s32.totalorder %s1989_s26, 3  ;;  %p204_p5 = scmp.ne.s32.totalorder %s2813_s19, %s2809_s18 }
   0x9   : > { %s3488_s28 = smov (%p35_p0, %s33_s28), 0  ;;  %s3490_s29 = smov (!%p35_p0, %s37_s29), %s2833_s24 }
   0xa   : > { %s184_s30 = ssub.s32 %s2829_s23, %s3488_s28  ;;  %p2933_p3 = por %p199_p2, %p198_p1 }
   0xb   : > { %p39_p4 = scmp.ge.s32.totalorder %s3490_s29, 2  ;;  %p205_p6 = scmp.eq.s32.totalorder %s1990_s27, 3 }
   0xc   : > { %p1993_p7 = scmp.ge.s32.totalorder %s2837_s25, 1  ;;  %p278_p9 = scmp.lt.s32.totalorder %s2837_s25, 5 }
   0xd   : > { %s3492_s29 = smov (%p39_p4, %s3490_s29), 0  ;;  %p2942_p8 = por %p205_p6, %p204_p5 }
   0xe   : > { %s183_s8 = ssub.s32 %s2833_s24, %s3492_s29  ;;  %s188_s9 = sadd.s32 1, %s2817_s20 }
   0xf   : > { %s185_s10 = sor.u32 %s184_s30, %s183_s8  ;;  %p279_p10 = pnand %p1993_p7, %p278_p9 }
  0x10   : > { %p186_p11 = scmp.eq.s32.totalorder %s185_s10, 0  ;;  %p338_p12 = scmp.lt.s32.totalorder (!%p279_p10), %s2825_s22, 1  ;;  %v2839_v0 = vmov (!%p279_p10), 0.0|0.0   ;;  %v2840_v1 = vmov (!%p279_p10), 0.0   ;;  %vm2841_vm0 = vmmov (!%p279_p10), 0   ;;  %v2842_v2 = vmov (!%p279_p10), 2  }
  0x11   : > { %282 = sbr.rel (%p279_p10) target bundleno = 898 (0x382), region = 40  ;;  %2459 = vmatprep.subr.bf16.mxu1 (!%p279_p10), %v2839_v0  ;;  %2539 = vmatprep.subr.bf16.mxu0 (!%p279_p10), %v2839_v0  ;;  %s1994_s12 = sshll.u32 (!%p279_p10), %s2821_s21, 4  ;;  %380 = vst [vmem:[#allocation2] sm:$0x7] (!%p279_p10), %v2840_v1  ;;  %v2843_v3 = vmov (!%p279_p10), 3   ;;  %vm424_vm1 = vcmask (!%p279_p10), 64512   ;;  %v417_v27 = vlaneseq (!%p279_p10) }
  0x12   : > { %s2951_s11 = scalar_select %p186_p11, %s2817_s20, %s188_s9  }
  0x13   : > { %2251 = vmatprep.mubr.msk.f32.mxu1 (!%p279_p10), %vm2841_vm0, %v2840_v1  ;;  %2356 = vmatprep.mubr.msk.f32.mxu0 (!%p279_p10), %vm2841_vm0, %v2840_v1  ;;  %p340_p13 = scmp.lt.s32.totalorder (!%p279_p10), %s1994_s12, 31  ;;  %s2844_s27 = smov (!%p279_p10), 2   ;;  %vm2978_vm2 = vmpackc.low (!%p279_p10), %vm424_vm1, %vm424_vm1  ;;  %v2845_v7 = vmov (!%p279_p10), 0   ;;  %v2846_v9 = vmov (!%p279_p10), 1   ;;  %v3065_v28 = vshrl.u32 (!%p279_p10), %v417_v27, 7  ;;  %v3067_v29 = vand.u32 (!%p279_p10), 127, %v417_v27 }
  0x14   : > { %2728 = vset.pattern.permute.xlu1 (!%p279_p10), %v2842_v2  ;;  %2730 = vset.pattern.permute.xlu0 (!%p279_p10), %v2843_v3  ;;  %vm1711_vm5 = vcmask (!%p279_p10), 39968   ;;  %p351_p0 = scmp.lt.s32.totalorder (!%p279_p10), %s2821_s21, 1 }
  0x15   : > { %vm421_vm3 = vcmp.eq.s32.totalorder (!%p279_p10), %v3065_v28, %v3067_v29 }
  0x16   : > { %v3083_v31 = vsel (!%p279_p10), %vm421_vm3, 1.0, %v2840_v1 }
  0x17   : > { %v426_v32 = vsel (!%p279_p10), %vm424_vm1, %v3083_v31, 0 }
  0x18   : > { %s2959_s13 = scalar_select %p338_p12, %s2825_s22, 1  ;;  %v3090_v34 = vsub.f32 %v426_v32, %v426_v32 }
  0x19   : > { %s3494_s12 = smov (!%p340_p13, %s1994_s12), 31 }
  0x1a   : > { %s2001_s14 = sshll.u32 %s2959_s13, 3  ;;  %s1995_s26 = sshll.u32 %s2959_s13, 5  ;;  %v559_v39 = vand.u32 4294901760, %v3090_v34 }
  0x1b   : > { %s371_s17 = scalar_lea.vmem %s3469_s3, %s2001_s14  ;;  %s343_s30 = sadd.s32 %s1995_s26, %s3494_s12 }
  0x1c   : > { %v2972_v4 = vld [vmem:[%s371_s17] sm:$0xff]  ;;  %s1996_s8 = sshll.u32 %s343_s30, 2  ;;  %v560_v45 = vsub.f32 %v3090_v34, %v559_v39  ;;  %s2847_s12 = smov 127  }
  0x1d   : > { %1181 = vrot.lane.b32.xlu0 %v2972_v4, %s2844_s27  ;;  %1136 = vperm.xlu1 %2728, %v2972_v4   ;;  %s2985_s15 = scalar_lea.vmem %s3466_s0, %s1996_s8  ;;  %vm1205_vm4 = vcmp.ge.f32.partialorder %v2972_v4, 0.0  ;;  %s1997_s17 = sshll.u32 %s2959_s13, 1 }
  0x1e   : > { %v2988_v6 = vld [vmem:[%s2985_s15] sm:$0xff]   ;;  %v3001_v8 = vld [vmem:[%s2985_s15 + $0x8] sm:$0xff]   ;;  %v3013_v10 = vld [vmem:[%s2985_s15 + $0x10] sm:$0xff]   ;;  %v561_v54 = vand.u32 4294901760, %v560_v45  ;;  %s352_s16 = scalar_select %p351_p0, %s2821_s21, 1 }
  0x1f   : > { %2462 = vmatpush3.bf16.xpose.msk.msra.mxu1 %vm2978_vm2, %v2988_v6  ;;  %2542 = vmatpush3.bf16.xpose.msk.msra.mxu0 %vm2978_vm2, %v2988_v6  ;;  %v2068_v11 = vunpack.c.l.bf16 %v2988_v6  ;;  %v2069_v12 = vunpack.c.h.bf16 %v2988_v6  ;;  %v2072_v13 = vunpack.c.l.bf16 %v3001_v8  ;;  %v2073_v14 = vunpack.c.h.bf16 %v3001_v8  ;;  %v3032_v19 = vld [vmem:[%s2985_s15 + $0x18] sm:$0xff]   ;;  %v3055_v26 = vld [vmem:[%s2985_s15 + $0x20] sm:$0xff]   ;;  %v3070_v30 = vld [vmem:[%s2985_s15 + $0x28] sm:$0xff]   ;;  %s2851_s13 = smov [#allocation3]  }
  0x20   : > { %2463 = vmatprep.subr.bf16.mxu1 %v2839_v0  ;;  %2543 = vmatprep.subr.bf16.mxu0 %v2839_v0  ;;  %v3088_v33 = vld [vmem:[%s2985_s15 + $0x30] sm:$0xff]   ;;  %v2076_v37 = vunpack.c.l.bf16 %v3013_v10  ;;  %v2077_v38 = vunpack.c.h.bf16 %v3013_v10  ;;  %v3108_v42 = vld [vmem:[%s2985_s15 + $0x38] sm:$0xff]   ;;  %v2080_v50 = vunpack.c.l.bf16 %v3032_v19  ;;  %v2081_v53 = vunpack.c.h.bf16 %v3032_v19  ;;  %s3299_s26 = sadd.s32 %s1997_s17, %s352_s16  ;;  %s334_s17 = sand.u32 1, %s2813_s19  }
  0x21   : > { %2729 = vset.pattern.permute.xlu1 %v2845_v7  ;;  %v429_v15 = vsel %vm424_vm1, %v2068_v11, 0  ;;  %v432_v16 = vsel %vm424_vm1, %v2069_v12, 0  ;;  %v435_v17 = vsel %vm424_vm1, %v2072_v13, 0  ;;  %v438_v18 = vsel %vm424_vm1, %v2073_v14, 0  ;;  %s1998_s27 = sshll.u32 %s3299_s26, 2  ;;  %s2062_s26 = sshll.u32 %s2825_s22, 1 }
  0x22   : > { %1145 = vperm.xlu1 %2729, %v2972_v4   ;;  %v3034_v20 = vsub.f32 %v429_v15, %v429_v15  ;;  %v3036_v21 = vsub.f32 %v432_v16, %v432_v16  ;;  %v3038_v22 = vsub.f32 %v435_v17, %v435_v17  ;;  %v3040_v23 = vsub.f32 %v438_v18, %v438_v18  ;;  %s366_s9 = scalar_lea.vmem %s3468_s2, %s1998_s27  ;;  %s356_s16 = scalar_lea.vmem %s3467_s1, %s1998_s27 }
  0x23   : > { %v441_v43 = vsel %vm424_vm1, %v2076_v37, 0  ;;  %v444_v44 = vsel %vm424_vm1, %v2077_v38, 0  ;;  %v447_v59 = vsel %vm424_vm1, %v2080_v50, 0  ;;  %v450_v60 = vsel %vm424_vm1, %v2081_v53, 0  ;;  %s1848_s27 = sadd.s32 %s2821_s21, %s2062_s26  ;;  %s335_s8 = scalar_lea.vmem [#allocation3], %s334_s17 }
  0x24   : > { %v2516_v24 = vpack.c.bf16 %v3036_v21, %v3034_v20  ;;  %v2519_v25 = vpack.c.bf16 %v3040_v23, %v3038_v22  ;;  %v570_v35 = vand.u32 4294901760, %v3034_v20  ;;  %v577_v36 = vand.u32 4294901760, %v3036_v21  ;;  %s2063_s30 = sshll.u32 %s1848_s27, 4  ;;  %s1838_s21 = scalar_lea.sflag [#allocation4], %s334_s17 }
  0x25   : > { %v584_v48 = vand.u32 4294901760, %v3038_v22  ;;  %v591_v49 = vand.u32 4294901760, %v3040_v23  ;;  %v3124_v51 = vsub.f32 %v441_v43, %v441_v43  ;;  %v3126_v52 = vsub.f32 %v444_v44, %v444_v44  ;;  %s3413_s15 = scalar_lea.hbm %s3471_s5, %s2063_s30 }
  0x26   : > { %2731 = vset.pattern.permute.xlu1 %v2846_v9  ;;  %v571_v40 = vsub.f32 %v3034_v20, %v570_v35  ;;  %v578_v41 = vsub.f32 %v3036_v21, %v577_v36  ;;  %v2572_v56 = vpack.c.bf16 %v577_v36, %v570_v35  ;;  %v3141_v3 = vsub.f32 %v447_v59, %v447_v59 }
  0x27   : > { %1165 = vperm.xlu1 %2731, %v2972_v4   ;;  %2466 = vmatpush3.bf16.xpose.msk.msra.mxu1 %vm2978_vm2, %v3001_v8  ;;  %v585_v57 = vsub.f32 %v3038_v22, %v584_v48  ;;  %v592_v58 = vsub.f32 %v3040_v23, %v591_v49  ;;  %v598_v63 = vand.u32 4294901760, %v3124_v51  ;;  %v3143_v9 = vsub.f32 %v450_v60, %v450_v60 }
  0x28   : > { %2546 = vmatpush3.bf16.xpose.msk.msra.mxu0 %vm2978_vm2, %v3001_v8  ;;  %2467 = vmatprep.subr.bf16.mxu1 %v2839_v0  ;;  %v572_v46 = vand.u32 4294901760, %v571_v40  ;;  %v579_v47 = vand.u32 4294901760, %v578_v41  ;;  %v2084_v11 = vunpack.c.l.bf16 %v3055_v26  ;;  %v2085_v12 = vunpack.c.h.bf16 %v3055_v26 }
  0x29   : > { %2547 = vmatprep.subr.bf16.mxu0 %v2839_v0  ;;  %v586_v61 = vand.u32 4294901760, %v585_v57  ;;  %v593_v62 = vand.u32 4294901760, %v592_v58  ;;  %v2575_v14 = vpack.c.bf16 %v591_v49, %v584_v48  ;;  %v599_v15 = vsub.f32 %v3124_v51, %v598_v63 }
  0x2a   : > { %v2492_v55 = vpack.c.bf16 %v579_v47, %v572_v46  ;;  %v453_v17 = vsel %vm424_vm1, %v2084_v11, 0  ;;  %v456_v18 = vsel %vm424_vm1, %v2085_v12, 0  ;;  %v612_v35 = vand.u32 4294901760, %v3141_v3 }
  0x2b   : > { %2732 = vset.pattern.permute.xlu1 %v2842_v2  ;;  %v605_v2 = vand.u32 4294901760, %v3126_v52  ;;  %v2495_v13 = vpack.c.bf16 %v593_v62, %v586_v61  ;;  %v600_v27 = vand.u32 4294901760, %v599_v15  ;;  %v619_v36 = vand.u32 4294901760, %v3143_v9 }
  0x2c   : > { %v3155_v37 = vsub.f32 %v453_v17, %v453_v17  ;;  %v3157_v38 = vsub.f32 %v456_v18, %v456_v18  ;;  %v2089_v40 = vunpack.c.h.bf16 %v3070_v30  ;;  %v613_v44 = vsub.f32 %v3141_v3, %v612_v35 }
  0x2d   : > { %v606_v16 = vsub.f32 %v3126_v52, %v605_v2  ;;  %v2578_v43 = vpack.c.bf16 %v605_v2, %v598_v63  ;;  %v620_v45 = vsub.f32 %v3143_v9, %v619_v36  ;;  %v2093_v57 = vunpack.c.h.bf16 %v3088_v33 }
  0x2e   : > { %v462_v47 = vsel %vm424_vm1, %v2089_v40, 0  ;;  %v614_v48 = vand.u32 4294901760, %v613_v44  ;;  %v626_v50 = vand.u32 4294901760, %v3155_v37  ;;  %v633_v53 = vand.u32 4294901760, %v3157_v38 }
  0x2f   : > { %2470 = vmatpush3.bf16.xpose.msk.msra.mxu1 %vm2978_vm2, %v3013_v10  ;;  %v607_v32 = vand.u32 4294901760, %v606_v16  ;;  %v621_v49 = vand.u32 4294901760, %v620_v45  ;;  %v2581_v59 = vpack.c.bf16 %v619_v36, %v612_v35  ;;  %v468_v63 = vsel %vm424_vm1, %v2093_v57, 0 }
  0x30   : > { %2550 = vmatpush3.bf16.xpose.msk.msra.mxu0 %vm2978_vm2, %v3013_v10  ;;  %2471 = vmatprep.subr.bf16.mxu1 %v2839_v0  ;;  %v627_v60 = vsub.f32 %v3155_v37, %v626_v50  ;;  %v634_v61 = vsub.f32 %v3157_v38, %v633_v53  ;;  %v3185_v15 = vsub.f32 %v468_v63, %v468_v63  ;;  %v2096_v16 = vunpack.c.l.bf16 %v3108_v42 }
  0x31   : > { %2551 = vmatprep.subr.bf16.mxu0 %v2839_v0  ;;  %v2498_v41 = vpack.c.bf16 %v607_v32, %v600_v27  ;;  %v2501_v58 = vpack.c.bf16 %v621_v49, %v614_v48  ;;  %v2097_v17 = vunpack.c.h.bf16 %v3108_v42  ;;  %v2584_v27 = vpack.c.bf16 %v633_v53, %v626_v50 }
  0x32   : > { %v628_v2 = vand.u32 4294901760, %v627_v60  ;;  %v635_v11 = vand.u32 4294901760, %v634_v61  ;;  %v471_v36 = vsel %vm424_vm1, %v2096_v16, 0  ;;  %v661_v44 = vand.u32 4294901760, %v3185_v15 }
  0x33   : > { %v3197_v45 = vsub.f32 %v471_v36, %v471_v36  ;;  %v2525_v20 = vpack.c.bf16 %v3143_v9, %v3141_v3  ;;  %v1712_v22 = vsel %vm1711_vm5, %v2972_v4, -inf  ;;  %v3312_v3 = vsub.s32 0, %v3065_v28 }
  0x34   : > { %v2504_v18 = vpack.c.bf16 %v635_v11, %v628_v2  ;;  %v662_v50 = vsub.f32 %v3185_v15, %v661_v44  ;;  %v1713_v23 = vrot.slane %v1712_v22, 4  ;;  %v1162_v9 = vsub.s32 1, %v3065_v28 }
  0x35   : > { %v668_v57 = vand.u32 4294901760, %v3197_v45 }
  0x37   : > { %2474 = vmatpush3.bf16.xpose.msk.msra.mxu1 %vm2978_vm2, %v3032_v19  ;;  %v669_v61 = vsub.f32 %v3197_v45, %v668_v57 }
  0x38   : > { %2554 = vmatpush3.bf16.xpose.msk.msra.mxu0 %vm2978_vm2, %v3032_v19  ;;  %2475 = vmatprep.subr.bf16.mxu1 %v2839_v0 }
  0x39   : > { %2555 = vmatprep.subr.bf16.mxu0 %v2839_v0 }
  0x3f   : > { %2478 = vmatpush3.bf16.xpose.msk.msra.mxu1 %vm2978_vm2, %v3055_v26 }
  0x40   : > { %2558 = vmatpush3.bf16.xpose.msk.msra.mxu0 %vm2978_vm2, %v3055_v26  ;;  %2479 = vmatprep.subr.bf16.mxu1 %v2839_v0 }
  0x41   : > { %2559 = vmatprep.subr.bf16.mxu0 %v2839_v0 }
  0x47   : > { %2482 = vmatpush3.bf16.xpose.msk.msra.mxu1 %vm2978_vm2, %v3070_v30 }
  0x48   : > { %2562 = vmatpush3.bf16.xpose.msk.msra.mxu0 %vm2978_vm2, %v3070_v30  ;;  %2483 = vmatprep.subr.bf16.mxu1 %v2839_v0 }
  0x49   : > { %2563 = vmatprep.subr.bf16.mxu0 %v2839_v0 }
  0x4f   : > { %2486 = vmatpush3.bf16.xpose.msk.msra.mxu1 %vm2978_vm2, %v3088_v33 }
  0x50   : > { %2566 = vmatpush3.bf16.xpose.msk.msra.mxu0 %vm2978_vm2, %v3088_v33  ;;  %2487 = vmatprep.subr.bf16.mxu1 %v2839_v0 }
  0x51   : > { %2567 = vmatprep.subr.bf16.mxu0 %v2839_v0 }
  0x57   : > { %2490 = vmatpush3.bf16.xpose.msk.msra.mxu1 %vm2978_vm2, %v3108_v42 }
  0x58   : > { %2570 = vmatpush3.bf16.xpose.msk.msra.mxu0 %vm2978_vm2, %v3108_v42  ;;  %2491 = vmatprep.subr.bf16.mxu1 %v2839_v0 }
  0x59   : > { %2571 = vmatprep.subr.bf16.mxu0 %v2839_v0 }
  0x5e   : > { %2252 = vmatmul.mubr.f32.vlgmr.msra.gmra.mrb[0].mxu1 %v561_v54 }
  0x5f   : > { %2357 = vmatmul.mubr.f32.vlgmr.msra.gmra.mrb[0].mxu0 %v559_v39  ;;  %2493 = vmatpush3.bf16.xpose.msra.mxu1 %v2492_v55  ;;  %v2088_v39 = vunpack.c.l.bf16 %v3070_v30  ;;  %v3171_v55 = vsub.f32 %v462_v47, %v462_v47 }
  0x60   : > { %2573 = vmatpush3.bf16.xpose.msra.mxu0 %v2572_v56  ;;  %2494 = vmatprep.subr.bf16.mxu1 %v2839_v0  ;;  %v2092_v56 = vunpack.c.l.bf16 %v3088_v33 }
  0x61   : > { %2574 = vmatprep.subr.bf16.mxu0 %v2839_v0  ;;  %2286 = vmatprep.mubr.msk.f32.mxu1 %vm2841_vm0, %v2840_v1  ;;  %v459_v46 = vsel %vm424_vm1, %v2088_v39, 0  ;;  %v474_v39 = vsel %vm424_vm1, %v2097_v17, 0 }
  0x62   : > { %2391 = vmatprep.mubr.msk.f32.mxu0 %vm2841_vm0, %v2840_v1  ;;  %v3169_v54 = vsub.f32 %v459_v46, %v459_v46  ;;  %v465_v62 = vsel %vm424_vm1, %v2092_v56, 0  ;;  %v3199_v46 = vsub.f32 %v474_v39, %v474_v39  ;;  %v663_v56 = vand.u32 4294901760, %v662_v50 }
  0x64   : > { %v640_v12 = vand.u32 4294901760, %v3169_v54  ;;  %v2537_v21 = vpack.c.bf16 %v3199_v46, %v3197_v45 }
  0x66   : > { %v641_v32 = vsub.f32 %v3169_v54, %v640_v12 }
  0x67   : > { %2496 = vmatpush3.bf16.xpose.msra.mxu1 %v2495_v13  ;;  %v647_v13 = vand.u32 4294901760, %v3171_v55 }
  0x68   : > { %2576 = vmatpush3.bf16.xpose.msra.mxu0 %v2575_v14  ;;  %2497 = vmatprep.subr.bf16.mxu1 %v2839_v0  ;;  %v3183_v14 = vsub.f32 %v465_v62, %v465_v62  ;;  %v642_v40 = vand.u32 4294901760, %v641_v32 }
  0x69   : > { %2577 = vmatprep.subr.bf16.mxu0 %v2839_v0  ;;  %v648_v35 = vsub.f32 %v3171_v55, %v647_v13  ;;  %v2587_v48 = vpack.c.bf16 %v647_v13, %v640_v12  ;;  %v670_v12 = vand.u32 4294901760, %v669_v61 }
  0x6f   : > { %2499 = vmatpush3.bf16.xpose.msra.mxu1 %v2498_v41  ;;  %v649_v41 = vand.u32 4294901760, %v648_v35 }
  0x70   : > { %2579 = vmatpush3.bf16.xpose.msra.mxu0 %v2578_v43  ;;  %2500 = vmatprep.subr.bf16.mxu1 %v2839_v0  ;;  %v654_v43 = vand.u32 4294901760, %v3183_v14 }
  0x71   : > { %2580 = vmatprep.subr.bf16.mxu0 %v2839_v0  ;;  %v2507_v47 = vpack.c.bf16 %v649_v41, %v642_v40 }
  0x72   : > { %v655_v49 = vsub.f32 %v3183_v14, %v654_v43  ;;  %v2590_v60 = vpack.c.bf16 %v661_v44, %v654_v43 }
  0x74   : > { %v656_v53 = vand.u32 4294901760, %v655_v49 }
  0x77   : > { %2502 = vmatpush3.bf16.xpose.msra.mxu1 %v2501_v58  ;;  %v675_v58 = vand.u32 4294901760, %v3199_v46 }
  0x78   : > { %2582 = vmatpush3.bf16.xpose.msra.mxu0 %v2581_v59  ;;  %2503 = vmatprep.subr.bf16.mxu1 %v2839_v0  ;;  %v2510_v59 = vpack.c.bf16 %v663_v56, %v656_v53 }
  0x79   : > { %2583 = vmatprep.subr.bf16.mxu0 %v2839_v0  ;;  %v676_v62 = vsub.f32 %v3199_v46, %v675_v58  ;;  %v2593_v17 = vpack.c.bf16 %v675_v58, %v668_v57 }
  0x7b   : > { %v677_v13 = vand.u32 4294901760, %v676_v62 }
  0x7d   : > { %v2513_v16 = vpack.c.bf16 %v677_v13, %v670_v12 }
  0x7f   : > { %2505 = vmatpush3.bf16.xpose.msra.mxu1 %v2504_v18  ;;  %v1206_v18 = vsel %vm1205_vm4, 1, %v2845_v7 }
  0x80   : > { %2585 = vmatpush3.bf16.xpose.msra.mxu0 %v2584_v27  ;;  %2506 = vmatprep.subr.bf16.mxu1 %v2839_v0  ;;  %v2848_v27 = vmov 4  }
  0x81   : > { %2586 = vmatprep.subr.bf16.mxu0 %v2839_v0 }
  0x87   : > { %2508 = vmatpush3.bf16.xpose.msra.mxu1 %v2507_v47 }
  0x88   : > { %2588 = vmatpush3.bf16.xpose.msra.mxu0 %v2587_v48  ;;  %2509 = vmatprep.subr.bf16.mxu1 %v2839_v0 }
  0x89   : > { %2589 = vmatprep.subr.bf16.mxu0 %v2839_v0 }
  0x8f   : > { %v1182_v63 = vpop.permute.xlu0 %1181  ;;  %2511 = vmatpush3.bf16.xpose.msra.mxu1 %v2510_v59 }
  0x90   : > { %v1184_v2 = vsub.f32 %v2972_v4, %v1182_v63  ;;  %2591 = vmatpush3.bf16.xpose.msra.mxu0 %v2590_v60  ;;  %2512 = vmatprep.subr.bf16.mxu1 %v2839_v0 }
  0x91   : > { %2592 = vmatprep.subr.bf16.mxu0 %v2839_v0 }
  0x92   : > { %v3210_v11 = vadd.f32 1.0, %v1184_v2 }
  0x94   : > { %1187 = vrot.lane.b32.xlu0 %v3210_v11, %s2847_s12  ;;  %s375_s12 = scalar_lea.vmem %s3470_s4, %s2001_s14  ;;  %s2747_s14 = sshll.u32 %s2851_s13, 4  ;;  %s2748_s14 = int_to_ptr.vmem [resolvable:$false] %s2747_s14 }
  0x95   : > { %v416_v12 = vld [vmem:[%s375_s12] sm:$0x1f] }
  0x97   : > { %2514 = vmatpush3.bf16.xpose.msra.mxu1 %v2513_v16  ;;  %v1231_v16 = vsel %vm424_vm1, %v416_v12, 0 }
  0x98   : > { %1156 = vperm.xlu0 %2730, %v2972_v4   ;;  %2594 = vmatpush3.bf16.xpose.msra.mxu0 %v2593_v17 }
  0x99   : > { %2515 = vmatprep.subr.bf16.mxu1 %v2839_v0  ;;  %2595 = vmatprep.subr.bf16.mxu0 %v2839_v0 }
  0x9c   : > { %2733 = vset.pattern.permute.xlu0 %v2848_v27  ;;  %v1137_v4 = vpop.permute.xlu1 %1136 }
  0x9d   : > { %1208 = vperm.xlu0 %2733, %v1206_v18  }
  0x9e   : > { %2287 = vmatmul.mubr.msk.f32.vlgmr.msra.gmra.mrb[0].mxu1 %vm424_vm1, %v3083_v31 }
  0x9f   : > { %2392 = vmatmul.mubr.msk.f32.vlgmr.msra.gmra.mrb[0].mxu0 %vm424_vm1, %v3083_v31  ;;  %2517 = vmatpush3.bf16.xpose.msra.mxu1 %v2516_v24  ;;  %v1714_v24 = vmax.f32 %v1712_v22, %v1713_v23 }
  0xa0   : > { %2598 = vmatpush3.bf16.xpose.msk.msra.mxu0 %vm2978_vm2, %v2988_v6  ;;  %2518 = vmatprep.subr.bf16.mxu1 %v2839_v0  ;;  %v2522_v6 = vpack.c.bf16 %v3126_v52, %v3124_v51  ;;  %v1132_v51 = vsub.s32 2, %v3065_v28 }
  0xa1   : > { %2599 = vmatprep.subr.bf16.mxu0 %v2839_v0  ;;  %2321 = vmatprep.mubr.msk.f32.mxu1 %vm2841_vm0, %v2840_v1  ;;  %v1146_v52 = vpop.permute.xlu1 %1145 }
  0xa2   : > { %2426 = vmatprep.mubr.msk.f32.mxu0 %vm2841_vm0, %v2840_v1 }
  0xa6   : > { %v1166_v35 = vpop.permute.xlu1 %1165 }
  0xa7   : > { %2520 = vmatpush3.bf16.xpose.msra.mxu1 %v2519_v25  ;;  %v1715_v25 = vrot.slane %v1714_v24, 2 }
  0xa8   : > { %2602 = vmatpush3.bf16.xpose.msk.msra.mxu0 %vm2978_vm2, %v3001_v8  ;;  %2521 = vmatprep.subr.bf16.mxu1 %v2839_v0  ;;  %v2528_v8 = vpack.c.bf16 %v3157_v38, %v3155_v37  ;;  %v1153_v37 = vsub.s32 3, %v3065_v28 }
  0xa9   : > { %2603 = vmatprep.subr.bf16.mxu0 %v2839_v0 }
  0xaf   : > { %2523 = vmatpush3.bf16.xpose.msra.mxu1 %v2522_v6  ;;  %v3332_v6 = vcvt.s32.f32 %v3065_v28 }
  0xb0   : > { %2606 = vmatpush3.bf16.xpose.msk.msra.mxu0 %vm2978_vm2, %v3013_v10  ;;  %2524 = vmatprep.subr.bf16.mxu1 %v2839_v0  ;;  %v2531_v10 = vpack.c.bf16 %v3171_v55, %v3169_v54 }
  0xb1   : > { %2607 = vmatprep.subr.bf16.mxu0 %v2839_v0 }
  0xb7   : > { %2526 = vmatpush3.bf16.xpose.msra.mxu1 %v2525_v20 }
  0xb8   : > { %2610 = vmatpush3.bf16.xpose.msk.msra.mxu0 %vm2978_vm2, %v3032_v19  ;;  %2527 = vmatprep.subr.bf16.mxu1 %v2839_v0  ;;  %v2534_v19 = vpack.c.bf16 %v3185_v15, %v3183_v14 }
  0xb9   : > { %2611 = vmatprep.subr.bf16.mxu0 %v2839_v0 }
  0xbf   : > { %2529 = vmatpush3.bf16.xpose.msra.mxu1 %v2528_v8 }
  0xc0   : > { %2614 = vmatpush3.bf16.xpose.msk.msra.mxu0 %vm2978_vm2, %v3055_v26  ;;  %2530 = vmatprep.subr.bf16.mxu1 %v2839_v0  ;;  %v1716_v26 = vmax.f32 %v1714_v24, %v1715_v25 }
  0xc1   : > { %2615 = vmatprep.subr.bf16.mxu0 %v2839_v0 }
  0xc7   : > { %2532 = vmatpush3.bf16.xpose.msra.mxu1 %v2531_v10 }
  0xc8   : > { %2618 = vmatpush3.bf16.xpose.msk.msra.mxu0 %vm2978_vm2, %v3070_v30  ;;  %2533 = vmatprep.subr.bf16.mxu1 %v2839_v0  ;;  %v1717_v30 = vrot.slane %v1716_v26, 1 }
  0xc9   : > { %2619 = vmatprep.subr.bf16.mxu0 %v2839_v0 }
  0xcf   : > { %2535 = vmatpush3.bf16.xpose.msra.mxu1 %v2534_v19 }
  0xd0   : > { %2622 = vmatpush3.bf16.xpose.msk.msra.mxu0 %vm2978_vm2, %v3088_v33  ;;  %2536 = vmatprep.subr.bf16.mxu1 %v2839_v0 }
  0xd1   : > { %2623 = vmatprep.subr.bf16.mxu0 %v2839_v0 }
  0xd7   : > { %2538 = vmatpush3.bf16.xpose.msra.mxu1 %v2537_v21 }
  0xd8   : > { %2626 = vmatpush3.bf16.xpose.msk.msra.mxu0 %vm2978_vm2, %v3108_v42  ;;  %2444 = vmatprep.subr.mxu1 %v2840_v1 }
  0xd9   : > { %2429 = vmatprep.subr.mxu0 %v2840_v1 }
  0xde   : > { %2322 = vmatmul.mubr.f32.vlgmr.msra.gmra.mrb[0].mxu1 %v3090_v34  ;;  %v3307_v34 = vld [vmem:[%s366_s9] sm:$0xf]  ;;  %s1852_s9 = sshll.u32 %s335_s8, 4  ;;  %s3415_s9 = int_to_ptr.vmem [resolvable:$true] %s1852_s9 }
  0xdf   : > { %2427 = vmatmul.mubr.msk.f32.vlgmr.msra.gmra.mrb[0].mxu0 %vm424_vm1, %v3083_v31  ;;  %2446 = vmatprep.mubr.msk.f32.mxu1 %vm2841_vm0, %v2840_v1  ;;  %v1718_v31 = vmax.f32 %v1716_v26, %v1717_v30  ;;  %v1173_v42 = vrot.slane %v3307_v34, 6  ;;  %v1133_v54 = vrot.slane %v3307_v34, %v1132_v51  ;;  %v1143_v55 = vrot.slane %v3307_v34, %v3312_v3  ;;  %s2743_s12 = scalar_lea.vmem %s3415_s9, 16  ;;  %p2750_p5 = scmp.lt.s32.totalorder %s3415_s9, %s2748_s14 }
  0xe0   : > { %2431 = vmatprep.mubr.msk.f32.mxu0 %vm2841_vm0, %v2840_v1  ;;  %v1163_v14 = vrot.slane %v3307_v34, %v1162_v9  ;;  %v1154_v15 = vrot.slane %v3307_v34, %v1153_v37  ;;  %vm1117_vm10 = vcmp.gt.f32.partialorder %v3307_v34, 0.0  ;;  %vm1122_vm11 = vcmp.lt.f32.partialorder %v3307_v34, 64.0  ;;  %p2744_p1 = scmp.ne.s32.totalorder %s3415_s9, %s2743_s12 }
  0xe1   : > { %vm1719_vm6 = vcmp.ge.f32.partialorder %v1718_v31, 0.0  ;;  %v3317_v38 = vsub.f32 %v3307_v34, %v1173_v42  ;;  %v1139_v39 = vmin.f32 %v1133_v54, %v1137_v4  ;;  %v1148_v40 = vmax.f32 %v1143_v55, %v1146_v52 }
  0xe2   : > { %v1720_v33 = vsel %vm1719_vm6, 1, %v2845_v7  ;;  %v1168_v41 = vmax.f32 %v1163_v14, %v1166_v35  ;;  %v1118_v55 = vsel %vm1117_vm10, 1, %v2845_v7  ;;  %p2745_p2 = pnand %p2744_p1, %p2933_p3 }
  0xe3   : > { %v1176_v32 = vadd.f32 1.0, %v3317_v38  ;;  %v1149_v45 = vsub.f32 %v1139_v39, %v1148_v40  ;;  %v1119_v14 = vrot.slane %v1118_v55, 1 }
  0xe4   : > { %p2746_p4 = pneg %p2745_p2 }
  0xe5   : > { %v1178_v44 = vrot.slane %v1176_v32, 1  ;;  %v1150_v48 = vmax.f32 %v1149_v45, 0.0  ;;  %vm1120_vm12 = vcmp.ne.s32.totalorder %v1119_v14, 0 }
  0xe6   : > { %vm3365_vm13 = vmand %vm1117_vm10, %vm1120_vm12  ;;  %vm1830_vm12 = vcmp.eq.s32.totalorder %v3067_v29, 1 }
  0xe7   : > { %v1180_v47 = vmul.f32 %v1178_v44, %v1176_v32 }
  0xe9   : > { %v1194_v50 = vrot.slane %v1180_v47, %v1132_v51  ;;  %v2849_v51 = vmov 1.0   ;;  %v1679_v47 = vmul.f32 0.5, %v3317_v38 }
 0x106   : > { %v1188_v0 = vpop.permute.xlu0 %1187 }
 0x107   : > { %v1190_v5 = vmul.f32 %v1188_v0, %v3210_v11 }
 0x109   : > { %1197 = vperm.xlu1 %2732, %v1190_v5  }
 0x10d   : > { %2734 = vset.pattern.permute.xlu1 %v2848_v27  ;;  %v1299_v27 = vand.u32 4294901760, %v1231_v16 }
 0x10e   : > { %1722 = vperm.xlu1 %2734, %v1720_v33  }
 0x10f   : > { %v1300_v8 = vsub.f32 %v1231_v16, %v1299_v27 }
 0x111   : > { %v1301_v0 = vand.u32 4294901760, %v1300_v8 }
 0x113   : > { %v1302_v23 = vsub.f32 %v1300_v8, %v1301_v0 }
 0x115   : > { %v1303_v31 = vand.u32 4294901760, %v1302_v23 }
 0x117   : > { %v1157_v36 = vpop.permute.xlu0 %1156 }
 0x118   : > { %v1159_v43 = vmin.f32 %v1154_v15, %v1157_v36  ;;  %v1123_v15 = vsel %vm1122_vm11, 1, %v2845_v7  ;;  %vm1816_vm11 = vcmask 1040384  }
 0x119   : > { %v1124_v32 = vrot.slane %v1123_v15, 2  ;;  %v1127_v39 = vrot.slane %v1123_v15, 3 }
 0x11a   : > { %v1169_v46 = vsub.f32 %v1159_v43, %v1168_v41 }
 0x11b   : > { %vm3369_vm14 = vcmp.ne.s32.totalorder %v1124_v32, 0  ;;  %vm1128_vm1 = vcmp.ne.s32.totalorder %v1127_v39, 0 }
 0x11c   : > { %v1170_v49 = vmax.f32 %v1169_v46, 0.0  ;;  %v1209_v60 = vpop.permute.xlu0 %1208 }
 0x11d   : > { %vm1210_vm7 = vcmp.eq.s32.totalorder %v1209_v60, 1  ;;  %v1681_v60 = vrot.slane %v1679_v47, 2 }
 0x11e   : > { %v1171_v56 = vmul.f32 %v1170_v49, %v1150_v48 }
 0x11f   : > { %v1683_v16 = vadd.f32 %v1681_v60, %v3307_v34 }
 0x188   : > { %v1198_v53 = vpop.permute.xlu1 %1197 }
 0x189   : > { %v1200_v57 = vadd.f32 %v1198_v53, %v1194_v50  ;;  %v2850_v50 = vmov -1.0  }
 0x18b   : > { %v1201_v58 = vsub.f32 %v1200_v57, %v1171_v56 }
 0x18d   : > { %v1202_v59 = vmax.f32 %v1201_v58, 0.0001  ;;  %v1723_v36 = vpop.permute.xlu1 %1722 }
 0x18e   : > { %vm1724_vm2 = vcmp.eq.s32.totalorder %v1723_v36, 1 }
 0x18f   : > { %2735 = vrcp.f32 %v1202_v59 }
 0x190   : > { %2737 = vrcp.f32 %v3317_v38 }
 0x199   : > { %v2736_v61 = vpop.eup %2735 }
 0x19a   : > { %v1204_v62 = vmul.f32 %v2736_v61, %v1171_v56  ;;  %v2738_v59 = vpop.eup %2737 }
 0x19c   : > { %v1211_v63 = vsel %vm1210_vm7, %v1204_v62, -1.0 }
 0x19d   : > { %v1212_v2 = vrot.slane %v1211_v63, 4 }
 0x19f   : > { %v1213_v11 = vmax.f32 %v1211_v63, %v1212_v2 }
 0x1a1   : > { %v1214_v13 = vrot.slane %v1213_v11, 2 }
 0x1a3   : > { %v1215_v17 = vmax.f32 %v1213_v11, %v1214_v13 }
 0x1a5   : > { %v1216_v18 = vrot.slane %v1215_v17, 1 }
 0x1a7   : > { %v3334_v20 = vmax.f32 %v1215_v17, %v1216_v18  ;;  %v1807_v17 = vld [vmem:[#allocation2 + $0x2] sm:$0x1] }
 0x1a9   : > { %vm1219_vm8 = vcmp.eq.f32.partialorder %v1211_v63, %v3334_v20  ;;  %vm1706_vm15 = vcmp.lt.f32.partialorder %v3334_v20, 0.4  ;;  %vm1708_vm3 = vcmp.ge.f32.partialorder %v3334_v20, 0.5  ;;  %v1734_v63 = vadd.f32 1.0, %v3332_v6 }
 0x1aa   : > { %v1220_v10 = vsel %vm1219_vm8, %v3332_v6, 8.0  ;;  %v1707_v53 = vsel %vm1706_vm15, 0.0, %v2850_v50  ;;  %vm1775_vm8 = vcmask 1041408  }
 0x1ab   : > { %v1221_v19 = vrot.slane %v1220_v10, 4 }
 0x1ad   : > { %v1222_v21 = vmin.f32 %v1220_v10, %v1221_v19 }
 0x1af   : > { %v1223_v5 = vrot.slane %v1222_v21, 2 }
 0x1b1   : > { %v1224_v22 = vmin.f32 %v1222_v21, %v1223_v5  ;;  %v818_v25 = vpop.f32.mrb[0].mxu1 }
 0x1b2   : > { %v1113_v26 = vpop.f32.mrb[0].mxu0  ;;  %v2323_v33 = vpop.f32.mrb[1].mxu1 }
 0x1b3   : > { %v1225_v24 = vrot.slane %v1224_v22, 1  ;;  %v2627_v28 = vadd.f32 %v1113_v26, %v818_v25  ;;  %v2428_v4 = vpop.f32.mrb[1].mxu0 }
 0x1b5   : > { %v1226_v30 = vmin.f32 %v1224_v22, %v1225_v24  ;;  %v1732_v45 = vmax.f32 %v2627_v28, 0.0001 }
 0x1b7   : > { %vm1227_vm9 = vcmp.eq.f32.partialorder %v3332_v6, %v1226_v30  ;;  %v1733_v56 = vmin.f32 %v1732_v45, 0.9999  ;;  %v413_v30 = vld [vmem:[%s356_s16] sm:$0xf]  ;;  %s2749_s16 = scalar_lea.vmem %s2748_s14, 32 }
 0x1b8   : > { %v2055_v42 = vsel %vm1227_vm9, 1.0, %v2840_v1  ;;  %2430 = vmatpush3.msk.msra.mxu0 %vm1227_vm9, %v2849_v51  ;;  %2445 = vmatpush3.msk.msra.mxu1 %vm1227_vm9, %v2849_v51  ;;  %p2751_p6 = scmp.lt.s32.totalorder %s2749_s16, %s2743_s12 }
 0x1b9   : > { %v1311_v52 = vsub.f32 %v2055_v42, %v2055_v42  ;;  %2447 = vmatmul.mubr.f32.vlgmr.msra.gmra.mrb[2].mxu1 %v1301_v0  ;;  %2432 = vmatmul.mubr.f32.vlgmr.msra.gmra.mrb[2].mxu0 %v1303_v31  ;;  %v1751_v2 = vsub.f32 1.0, %v1733_v56 }
 0x1ba   : > { %2449 = vmatprep.subr.mxu1 %v2840_v1  ;;  %2434 = vmatprep.subr.mxu0 %v2840_v1  ;;  %p2752_p7 = por %p2751_p6, %p2750_p5 }
 0x1bb   : > { %v1312_v9 = vand.u32 4294901760, %v1311_v52  ;;  %2451 = vmatprep.mubr.msk.f32.mxu1 %vm2841_vm0, %v2840_v1  ;;  %2436 = vmatprep.mubr.msk.f32.mxu0 %vm2841_vm0, %v2840_v1 }
 0x1bc   : > { %p2753_p9 = pnand %p2752_p7, %p2746_p4 }
 0x1bd   : > { %2450 = vmatpush3.msra.mxu1 %v1312_v9  ;;  %v1313_v37 = vsub.f32 %v1311_v52, %v1312_v9 }
 0x1be   : > { %2454 = vmatprep.subr.mxu1 %v2840_v1 }
 0x1bf   : > { %v1314_v54 = vand.u32 4294901760, %v1313_v37 }
 0x1c1   : > { %2435 = vmatpush3.msra.mxu0 %v1314_v54  ;;  %2452 = vmatmul.mubr.f32.vlgmr.msra.gmra.mrb[2].mxu1 %v1299_v27 }
 0x1c2   : > { %2455 = vmatpush3.msk.msra.mxu1 %vm1227_vm9, %v2849_v51  ;;  %2437 = vmatmul.mubr.f32.vlgmr.msra.gmra.mrb[2].mxu0 %v1299_v27 }
 0x1c3   : > { %2439 = vmatprep.subr.mxu0 %v2840_v1  ;;  %2456 = vmatprep.mubr.msk.f32.mxu1 %vm2841_vm0, %v2840_v1 }
 0x1c4   : > { %2440 = vmatpush3.msra.mxu0 %v1311_v52  ;;  %2441 = vmatprep.mubr.msk.f32.mxu0 %vm2841_vm0, %v2840_v1  ;;  %vm1126_vm0 = vmand %vm3365_vm13, %vm3369_vm14  ;;  %vm1828_vm13 = vcmp.eq.s32.totalorder %v3067_v29, 0  ;;  %vm1833_vm14 = vcmp.eq.s32.totalorder %v3067_v29, 2 }
 0x1c5   : > { %vm1129_vm4 = vmand %vm1126_vm0, %vm1128_vm1 }
 0x1c9   : > { %2457 = vmatmul.mubr.f32.vlgmr.msra.gmra.mrb[2].mxu1 %v1299_v27 }
 0x1ca   : > { %2442 = vmatmul.mubr.f32.vlgmr.msra.gmra.mrb[2].mxu0 %v1300_v8  ;;  %v1698_v8 = vrot.slane %v2738_v59, 2 }
 0x29c   : > { %v1675_v35 = vpop.f32.mrb[2].mxu1 }
 0x29d   : > { %v1455_v40 = vpop.f32.mrb[2].mxu0  ;;  %v2458_v41 = vpop.f32.mrb[3].mxu1 }
 0x29e   : > { %v2628_v46 = vadd.f32 %v1675_v35, %v1455_v40  ;;  %v2443_v7 = vpop.f32.mrb[3].mxu0 }
 0x2a0   : > { %v1687_v48 = vrot.slane %v2628_v46, 6  ;;  %v1709_v49 = vadd.f32 1.0, %v2628_v46 }
 0x2a2   : > { %v1689_v57 = vsub.f32 %v2628_v46, %v1687_v48  ;;  %v1710_v58 = vsel %vm1708_vm3, %v1709_v49, %v1707_v53 }
 0x2a3   : > { %v1725_v38 = vsel %vm1724_vm2, %v1710_v58, -1.0  ;;  %v1801_v58 = vld [vmem:[#allocation2] sm:$0x1] }
 0x2a4   : > { %v1690_v61 = vmax.f32 %v1689_v57, 1.0  ;;  %v1727_v62 = vrot.slane %v1725_v38, 4 }
 0x2a6   : > { %v1691_v11 = vmul.f32 0.5, %v1690_v61  ;;  %v1702_v12 = vmul.f32 %v2738_v59, %v1690_v61  ;;  %v3381_v13 = vsel %vm1129_vm4, %v1727_v62, -1.0 }
 0x2a7   : > { %vm1730_vm5 = vcmp.gt.f32.partialorder %v3381_v13, 0.0  ;;  %vm1731_vm6 = vcmp.ge.f32.partialorder %v3381_v13, 0.0  ;;  %v1738_v18 = vrot.slane %v3381_v13, %v3312_v3 }
 0x2a8   : > { %v1693_v27 = vrot.slane %v1691_v11, 2  ;;  %2739 = vlog2.f32 %v1702_v12  ;;  %v1740_v6 = vsel %vm1731_vm6, 0.25, %v2840_v1  ;;  %v1741_v20 = vsel %vm1731_vm6, 0.75, %v2840_v1 }
 0x2a9   : > { %vm1739_vm7 = vcmp.eq.f32.partialorder %v1738_v18, %v1734_v63  ;;  %v1745_v10 = vrot.slane %v1740_v6, %v3312_v3  ;;  %v2061_v34 = vsel %vm1730_vm5, 1.0, %v2840_v1  ;;  %v1749_v21 = vrot.slane %v1741_v20, %v3312_v3  ;;  %v1804_v18 = vld [vmem:[#allocation2 + $0x1] sm:$0x1] }
 0x2aa   : > { %v1695_v19 = vadd.f32 %v2628_v46, %v1693_v27  ;;  %v1752_v0 = vsel %vm1739_vm7, %v1733_v56, %v1751_v2  ;;  %v1810_v5 = vadd.f32 %v2061_v34, %v1807_v17 }
 0x2ab   : > { %v1753_v22 = vsub.f32 1.0, %v1752_v0  ;;  %2741 = vlog2.f32 %v1752_v0  ;;  %v1750_v26 = vsel %vm1739_vm7, %v1745_v10, %v1749_v21 }
 0x2ac   : > { %v1696_v23 = vsub.f32 %v1695_v19, %v1683_v16  ;;  %1811 = vst [vmem:[#allocation2 + $0x2] sm:$0x1] %v1810_v5 }
 0x2ad   : > { %v1754_v24 = vmul.f32 %v1753_v22, %v1753_v22 }
 0x2ae   : > { %v1700_v25 = vmul.f32 %v1698_v8, %v1696_v23 }
 0x2af   : > { %v1755_v31 = vmul.f32 %v1754_v24, %v1750_v26 }
 0x2b0   : > { %v1701_v1 = vmul.f32 10.0, %v1700_v25 }
 0x2b2   : > { %v2740_v28 = vpop.eup %2739  ;;  %v1766_v33 = vsub.f32 %v413_v30, %v1701_v1 }
 0x2b3   : > { %v1704_v3 = vmul.f32 0.6931472, %v2740_v28  ;;  %v1824_v21 = vld [vmem:[#allocation2 + $0x2] sm:$0x1] }
 0x2b4   : > { %v1767_v4 = vand.u32 2147483647, %v1766_v33  ;;  %v1825_v0 = vsel %vm1816_vm11, %v1824_v21, 0.0 }
 0x2b5   : > { %v2742_v42 = vpop.eup %2741  ;;  %v1705_v51 = vmul.f32 5.0, %v1704_v3 }
 0x2b6   : > { %v1772_v52 = vmul.f32 %v1767_v4, %v1767_v4  ;;  %v1757_v9 = vmul.f32 0.6931472, %v2742_v42  ;;  %v2059_v54 = vadd.f32 -0.055555556, %v1767_v4  ;;  %vm1770_vm9 = vcmp.ge.f32.partialorder %v1767_v4, 0.11111111 }
 0x2b7   : > { %v1768_v37 = vsub.f32 %v413_v30, %v1705_v51 }
 0x2b8   : > { %v1773_v55 = vmul.f32 4.5, %v1772_v52  ;;  %v1758_v14 = vsub.f32 0.0, %v1757_v9 }
 0x2b9   : > { %v1769_v15 = vand.u32 2147483647, %v1768_v37 }
 0x2ba   : > { %v1759_v32 = vmul.f32 %v1758_v14, %v1755_v31  ;;  %v1774_v35 = vsel %vm1770_vm9, %v2059_v54, %v1773_v55 }
 0x2bb   : > { %v1785_v36 = vmul.f32 %v1769_v15, %v1769_v15  ;;  %v1776_v39 = vsel %vm1775_vm8, %v1774_v35, 0.0  ;;  %v2060_v43 = vadd.f32 -0.055555556, %v1769_v15  ;;  %vm1783_vm10 = vcmp.ge.f32.partialorder %v1769_v15, 0.11111111 }
 0x2bc   : > { %v1760_v40 = vrot.slane %v1759_v32, 4  ;;  %v1777_v41 = vrot.slane %v1776_v39, 4 }
 0x2bd   : > { %v1786_v44 = vmul.f32 4.5, %v1785_v36 }
 0x2be   : > { %v1761_v45 = vadd.f32 %v1760_v40, %v1759_v32  ;;  %v1778_v46 = vadd.f32 %v1777_v41, %v1776_v39 }
 0x2bf   : > { %v1787_v7 = vsel %vm1783_vm10, %v2060_v43, %v1786_v44 }
 0x2c0   : > { %v1762_v47 = vrot.slane %v1761_v45, 2  ;;  %v1789_v48 = vrot.slane %v1787_v7, 2  ;;  %v1779_v49 = vrot.slane %v1778_v46, 2 }
 0x2c2   : > { %v1763_v50 = vadd.f32 %v1762_v47, %v1761_v45  ;;  %v1791_v53 = vsel %vm1775_vm8, %v1789_v48, 0.0  ;;  %v1780_v59 = vadd.f32 %v1779_v49, %v1778_v46 }
 0x2c3   : > { %v1792_v56 = vrot.slane %v1791_v53, 4 }
 0x2c4   : > { %v1764_v57 = vrot.slane %v1763_v50, 1  ;;  %v1781_v63 = vrot.slane %v1780_v59, 1 }
 0x2c5   : > { %v1793_v60 = vadd.f32 %v1792_v56, %v1791_v53 }
 0x2c6   : > { %v1765_v38 = vadd.f32 %v1764_v57, %v1763_v50  ;;  %v1782_v12 = vadd.f32 %v1781_v63, %v1780_v59 }
 0x2c7   : > { %v1794_v61 = vrot.slane %v1793_v60, 2 }
 0x2c8   : > { %v1802_v62 = vadd.f32 %v1801_v58, %v1765_v38 }
 0x2c9   : > { %v1795_v2 = vadd.f32 %v1794_v61, %v1793_v60 }
 0x2ca   : > { %1803 = vst [vmem:[#allocation2] sm:$0x1] %v1802_v62 }
 0x2cb   : > { %v1796_v11 = vrot.slane %v1795_v2, 1 }
 0x2cd   : > { %v1797_v16 = vadd.f32 %v1796_v11, %v1795_v2 }
 0x2cf   : > { %v1798_v17 = vadd.f32 %v1797_v16, %v1782_v12 }
 0x2d1   : > { %v1799_v27 = vmul.f32 0.25, %v1798_v17  ;;  %v1815_v6 = vld [vmem:[#allocation2] sm:$0x1] }
 0x2d2   : > { %v1817_v20 = vsel %vm1816_vm11, %v1815_v6, 0.0 }
 0x2d3   : > { %v1800_v8 = vsel %vm1730_vm5, %v1799_v27, 0.0  ;;  %1818 = vadd.xlane.f32.xlu1 %v1817_v20 }
 0x2d4   : > { %v1805_v10 = vadd.f32 %v1804_v18, %v1800_v8 }
 0x2d6   : > { %1806 = vst [vmem:[#allocation2 + $0x1] sm:$0x1] %v1805_v10 }
 0x2dd   : > { %v1820_v34 = vld [vmem:[#allocation2 + $0x1] sm:$0x1] }
 0x2de   : > { %v1821_v19 = vsel %vm1816_vm11, %v1820_v34, 0.0 }
 0x2df   : > { %1822 = vadd.xlane.f32.xlu0 %v1821_v19 }
 0x2e3   : > { %1826 = vadd.xlane.f32.xlu0 %v1825_v0 }
 0x360   : > { %v1819_v5 = vpop.xlane.xlu1 %1818 }
 0x361   : > { %v1829_v23 = vsel %vm1828_vm13, %v1819_v5, 0.0 }
 0x36c   : > { %v1823_v22 = vpop.xlane.xlu0 %1822 }
 0x36d   : > { %v1831_v13 = vsel %vm1830_vm12, %v1823_v22, 0.0 }
 0x36e   : > { %v1832_v24 = vadd.f32 %v1831_v13, %v1829_v23 }
 0x370   : > { %v1827_v25 = vpop.xlane.xlu0 %1826 }
 0x371   : > { %v1834_v26 = vsel %vm1833_vm14, %v1827_v25, 0.0 }
 0x372   : > { %v1835_v30 = vadd.f32 %v1834_v26, %v1832_v24 }
 0x374   : > { %1836 = vst [vmem:[%s335_s8] sm:$0x1] %v1835_v30 }
 0x375   : > { %2756 = shalt.err (!%p2753_p9)
}
 0x376   : > { %s2757_s17 = scalar_lea.hbm %s3413_s15, 16  ;;  %s2761_s30 = scalar_lea.hbm %s3471_s5, 64 }
 0x377   : > { %p2758_p10 = scmp.ne.s32.totalorder %s3413_s15, %s2757_s17  ;;  %p2762_p13 = scmp.lt.u32.totalorder %s3413_s15, %s3471_s5 }
 0x378   : > { %p2763_p0 = scmp.lt.u32.totalorder %s2761_s30, %s2757_s17  ;;  %p2765_p2 = scmp.lt.u32.totalorder %s2757_s17, %s3413_s15 }
 0x379   : > { %p2759_p11 = pnand %p2758_p10, %p2933_p3 }
 0x37a   : > { %p2764_p1 = por %p2763_p0, %p2762_p13 }
 0x37b   : > { %p2760_p12 = pneg %p2759_p11 }
 0x37c   : > { %p2766_p4 = por %p2765_p2, %p2764_p1 }
 0x37e   : > { %p2767_p5 = pnand %p2766_p4, %p2760_p12 }
 0x380   : > { %2770 = shalt.err (!%p2767_p5)
}
 0x381   : > { %2645 = dma.vmem_to_hbm [thread:$0]  (%p2933_p3), %s3415_s9, 16, %s3413_s15, %s1838_s21  }
 0x382 PF: > { %p2651_p6 = scmp.ge.s32.totalorder %s2837_s25, 2  ;;  %s1864_s10 = sand.u32 1, %s2809_s18  }
 0x383   : > { %s1865_s12 = scalar_lea.sflag [#allocation4], %s1864_s10 }
 0x384   : > { %p2648_p7 = pnand %p2651_p6, %p2942_p8 }
 0x386   : > { %2804 = dma.done.wait (!%p2648_p7), %s1865_s12, 16  }
 0x387   : > { %2806 = vsyncadd (!%p2648_p7), %s1865_s12, 4294967280  ;;  %s18_s25 = sadd.s32 1, %s2837_s25   ;;  %s3480_s18 = smov %s2813_s19 }
 0x388   : > { %p15_p9 = scmp.ge.s32.totalorder %s18_s25, 6   ;;  %s3481_s19 = smov %s2817_s20 }
 0x389   : > { %s3482_s20 = smov %s2951_s11  ;;  %s3483_s21 = smov %s2829_s23 }
 0x38a   : > { %s3484_s22 = smov %s2833_s24  ;;  %s3485_s23 = smov %s3488_s28 }
 0x38b   : > { %s3486_s24 = smov %s3492_s29  ;;  %17 = sbr.rel (!%p15_p9) target bundleno = 5 (0x5), region = 95 }
 0x392   :  { %1869 = vsyncpa [#allocation4], 1 }
 0x393   :  { %1871 = vsyncpa [#allocation4 + $0x1], 1 }

</bundles_post_ra>
